<compile_context>
chip_gen: v6e
topology: v6e:2x2x1
jax: 0.10.0
libtpu: 0.0.40
codegen_flags: <defaults>
</compile_context>

<pallas_src>
import functools

import jax
import jax.numpy as jnp
from jax.experimental import pallas as pl
from jax.experimental.pallas import tpu as pltpu

# Single source of truth for the 3x3 tap ordering (kernel taps, weights and
# border masks are all generated from this list -> they can never disagree).
_TAP_OFFSETS = tuple((dy, dx) for dy in (-1, 0, 1) for dx in (-1, 0, 1))


def _resplus_kernel(xr_ref, bnc_ref, w1_ref, b1_ref, wp_ref, bpf_ref,
                    w2_ref, b2_ref, mask_ref, out_ref,
                    *, Bt, C, C1, OC, H, W):
    # xr_ref:  (Bt*C, HW)      channel-row major pixels, rows ordered (batch, channel)
    # bnc_ref: (4, Bt*C, 1)    rows = [scale1, shift1, scale2, shift2] tiled per image
    # w1_ref:  (C1, 9*C)       conv1 taps fused along K (k*C + c)
    # b1_ref:  (C1, 1)
    # wp_ref:  (C*HW, OC*HW)   plus_conv weight as one dense matmul operand
    # bpf_ref: (1, OC*HW)
    # w2_ref:  (C, 9*C)        conv2 taps fused along K
    # b2_ref:  (C, 1)
    # mask_ref:(9, HW)         1.0 where the shifted tap stays inside the image
    # out_ref: (Bt*C, HW)
    HW = H * W

    x_rows = xr_ref[...]                                   # (Bt*C, HW)
    s1 = bnc_ref[0]
    t1 = bnc_ref[1]
    s2 = bnc_ref[2]
    t2 = bnc_ref[3]

    def rolled_taps(a):
        """9 border-masked shifted copies of a (rows, HW) slab (2-D lane rolls)."""
        taps = []
        for k, (dy, dx) in enumerate(_TAP_OFFSETS):
            off = dy * W + dx
            if off == 0:
                taps.append(a)                             # mask is all-ones for (0,0)
            else:
                taps.append(pltpu.roll(a, shift=(-off) % HW, axis=1)
                            * mask_ref[k:k + 1, :])
        return taps

    def conv3x3_image(taps, b, w_ref, b_ref):
        """One fused K = 9*C matmul for image b: (Cout, 9C) @ (9C, HW)."""
        slab = jnp.concatenate([t[b * C:(b + 1) * C, :] for t in taps], axis=0)
        return jnp.dot(w_ref[...], slab,
                       preferred_element_type=jnp.float32) + b_ref[...]

    # --- branch 1: bn1 -> relu -> dropout(eval: identity); conv1 per image below ---
    a1 = jnp.maximum(x_rows * s1 + t1, 0.0)                # (Bt*C, HW)
    taps1 = rolled_taps(a1)

    # --- branch 2: relu -> bn1 -> plus_conv as ONE big matmul (M = Bt, K = C*HW) ---
    a2 = jnp.maximum(x_rows, 0.0) * s1 + t1                # (Bt*C, HW)
    a2_flat = jnp.concatenate(
        [jnp.concatenate([a2[b * C + c:b * C + c + 1, :] for c in range(C)], axis=1)
         for b in range(Bt)], axis=0)                      # (Bt, C*HW), lane-dense
    z2_flat = jnp.dot(a2_flat, wp_ref[...],
                      preferred_element_type=jnp.float32) + bpf_ref[...]   # (Bt, OC*HW)

    # --- concat([z1, z2], channel) assembled as (batch, channel) rows: values only,
    #     no VMEM-scratch round-trip, no single-row masked stores ---
    cat_rows = []
    for b in range(Bt):
        z1_b = conv3x3_image(taps1, b, w1_ref, b1_ref)                       # (C1, HW)
        z2_b = jnp.concatenate(
            [z2_flat[b:b + 1, oc * HW:(oc + 1) * HW] for oc in range(OC)],
            axis=0)                                                          # (OC, HW)
        cat_rows.append(jnp.concatenate([z1_b, z2_b], axis=0))               # (C, HW)
    cat = jnp.concatenate(cat_rows, axis=0)                                  # (Bt*C, HW)

    # --- merge: bn2 -> relu -> dropout(id) -> conv2 -> + x ; one dense block store ---
    a3 = jnp.maximum(cat * s2 + t2, 0.0)
    taps3 = rolled_taps(a3)
    out_rows = []
    for b in range(Bt):
        z3_b = conv3x3_image(taps3, b, w2_ref, b2_ref)                       # (C, HW)
        out_rows.append(z3_b + x_rows[b * C:(b + 1) * C, :])
    out_ref[...] = jnp.concatenate(out_rows, axis=0).astype(out_ref.dtype)


def _pick_batch_tile(B, C, max_rows=256):
    """Batch tile: divides B, Bt*C <= max_rows (bounds trace-time unroll / VMEM),
    Bt*C a multiple of 8 (sublane-dense loads/stores) or Bt == B; prefer leaving
    >=2 grid steps (v7x dual TensorCore) when that keeps 8-row alignment."""
    cands = [bt for bt in range(1, B + 1)
             if B % bt == 0 and bt * C <= max_rows
             and (bt == B or (bt * C) % 8 == 0)]
    if not cands:
        return B
    best = max(cands)
    smaller = [bt for bt in cands if bt < B and (bt * C) % 8 == 0]
    if best == B and smaller:
        best = max(smaller)
    return best


def resplus_pallas(x, params, eps=1e-5):
    """x: (B, C, H, W) NCHW float32.  params from make_params (PyTorch layout)."""
    (g1, be1, m1, v1, w1, cb1, g2, be2, m2, v2, w2, cb2, wp, bp) = params
    B, C, H, W = x.shape
    HW = H * W
    C1 = w1.shape[0]                 # in_channels - out_channels
    OC = C - C1                      # out_channels
    assert wp.shape == (OC * HW, C, H, W)

    Bt = _pick_batch_tile(B, C)
    n_steps = B // Bt

    # Eval-mode BatchNorm folded to per-channel scale/shift.
    s1 = g1 / jnp.sqrt(v1 + eps)
    t1 = be1 - m1 * s1
    s2 = g2 / jnp.sqrt(v2 + eps)
    t2 = be2 - m2 * s2
    # Per-row (batch, channel) columns, tiled for the batch tile: (4, Bt*C, 1).
    bn_cols = jnp.stack([jnp.tile(s1, Bt), jnp.tile(t1, Bt),
                         jnp.tile(s2, Bt), jnp.tile(t2, Bt)], axis=0)[..., None]

    # Conv taps fused along K:  (Cout, 9*C), K index = k*C + c with k = kh*3 + kw.
    w1f = jnp.transpose(w1, (0, 2, 3, 1)).reshape(C1, 9 * C)
    w2f = jnp.transpose(w2, (0, 2, 3, 1)).reshape(C, 9 * C)
    b1c = cb1.reshape(C1, 1)
    b2c = cb2.reshape(C, 1)

    # plus_conv weight (OC*HW, C, H, W) -> one dense (C*HW, OC*HW) matmul operand.
    wp2d = jnp.transpose(wp.reshape(OC * HW, C, HW), (1, 2, 0)).reshape(C * HW, OC * HW)
    bpf = bp.reshape(1, OC * HW)

    # Border masks for the 9 conv taps (float 0/1), shape (9, HW) -- same tap
    # ordering as the kernel (_TAP_OFFSETS).
    pidx = jnp.arange(HW, dtype=jnp.int32)
    hh, ww = pidx // W, pidx % W
    masks = []
    for dy, dx in _TAP_OFFSETS:
        masks.append((hh + dy >= 0) & (hh + dy < H) & (ww + dx >= 0) & (ww + dx < W))
    mask_arr = jnp.stack(masks, axis=0).astype(jnp.float32)       # (9, HW)

    # NCHW -> channel-row major flat pixels: pure reshape, no transpose.
    x_rows = x.reshape(B * C, HW)

    kernel = functools.partial(_resplus_kernel, Bt=Bt, C=C, C1=C1, OC=OC, H=H, W=W)

    def resident(shape):
        # Constant-index full block: fetched once, re-used every grid step.
        # TODO(synk): at non-toy sizes, single-buffer this (pl.Buffered(1)) and/or
        # stream wp2d over an 'arbitrary' K grid axis instead of keeping it resident.
        return pl.BlockSpec(shape, lambda i, _n=len(shape): (0,) * _n)

    out = pl.pallas_call(
        kernel,
        out_shape=jax.ShapeDtypeStruct((B * C, HW), jnp.float32),
        grid=(n_steps,),
        in_specs=[
            pl.BlockSpec((Bt * C, HW), lambda i: (i, 0)),    # x rows (one batch tile)
            resident((4, Bt * C, 1)),                        # packed BN scale/shift
            resident((C1, 9 * C)),                           # conv1 fused taps
            resident((C1, 1)),                               # conv1 bias
            resident((C * HW, OC * HW)),                     # plus_conv weight
            resident((1, OC * HW)),                          # plus_conv bias
            resident((C, 9 * C)),                            # conv2 fused taps
            resident((C, 1)),                                # conv2 bias
            resident((9, HW)),                               # border masks
        ],
        out_specs=pl.BlockSpec((Bt * C, HW), lambda i: (i, 0)),
        compiler_params=pltpu.CompilerParams(
            dimension_semantics=("parallel",),
            vmem_limit_bytes=64 * 1024 * 1024),
    )(x_rows, bn_cols, w1f, b1c, wp2d, bpf, w2f, b2c, mask_arr)

    return out.reshape(B, C, H, W)


def make_params(key, in_channels, out_channels, H, W):
    """Deterministic synthetic weights in PyTorch layouts (eval-mode BN stats)."""
    C, OC = in_channels, out_channels
    C1 = C - OC
    HW = H * W
    ks = jax.random.split(key, 14)
    u = lambda k, s: jax.random.uniform(k, s, jnp.float32, 0.5, 1.5)
    n = lambda k, s, sc=0.1: jax.random.normal(k, s, jnp.float32) * sc
    g1, be1, m1, v1 = u(ks[0], (C,)), n(ks[1], (C,)), n(ks[2], (C,)), u(ks[3], (C,))
    w1, cb1 = n(ks[4], (C1, C, 3, 3)), n(ks[5], (C1,))
    g2, be2, m2, v2 = u(ks[6], (C,)), n(ks[7], (C,)), n(ks[8], (C,)), u(ks[9], (C,))
    w2, cb2 = n(ks[10], (C, C, 3, 3)), n(ks[11], (C,))
    wp, bp = n(ks[12], (OC * HW, C, H, W), 0.05), n(ks[13], (OC * HW,))
    return (g1, be1, m1, v1, w1, cb1, g2, be2, m2, v2, w2, cb2, wp, bp)


def resplus_reference(x, params, eps=1e-5):
    """Pure-JAX (XLA) reference of the same eval-mode forward pass."""
    (g1, be1, m1, v1, w1, cb1, g2, be2, m2, v2, w2, cb2, wp, bp) = params
    B, C, H, W = x.shape
    HW = H * W
    OC = wp.shape[0] // HW
    hp = jax.lax.Precision.HIGHEST

    def bn(y, g, b, m, v):
        s = g / jnp.sqrt(v + eps)
        return y * s.reshape(1, -1, 1, 1) + (b - m * s).reshape(1, -1, 1, 1)

    def conv3x3(y, w, b):
        yp = jnp.pad(y, ((0, 0), (0, 0), (1, 1), (1, 1)))
        out = b.reshape(1, -1, 1, 1)
        for kh in range(3):
            for kw in range(3):
                out = out + jnp.einsum('bchw,oc->bohw',
                                       yp[:, :, kh:kh + H, kw:kw + W],
                                       w[:, :, kh, kw], precision=hp)
        return out

    relu = lambda y: jnp.maximum(y, 0.0)

    z1 = conv3x3(relu(bn(x, g1, be1, m1, v1)), w1, cb1)
    a2 = bn(relu(x), g1, be1, m1, v1)
    z2 = (jnp.einsum('bcij,qcij->bq', a2, wp, precision=hp) + bp).reshape(B, OC, H, W)
    z3 = jnp.concatenate([z1, z2], axis=1)
    z3 = conv3x3(relu(bn(z3, g2, be2, m2, v2)), w2, cb2)
    return z3 + x


if __name__ == "__main__":
    # Small shapes consistent with the module: in_channels > out_channels.
    B, in_channels, out_channels, H, W = 2, 4, 2, 16, 16

    key = jax.random.PRNGKey(0)
    kx, kp = jax.random.split(key)
    x = jax.random.normal(kx, (B, in_channels, H, W), jnp.float32)
    params = make_params(kp, in_channels, out_channels, H, W)

    out = resplus_pallas(x, params)
    jax.block_until_ready(out)

    ref = resplus_reference(x, params)
    assert out.shape == (B, in_channels, H, W)
    assert jnp.allclose(out, ref, atol=1e-4, rtol=1e-4), "mismatch vs reference"

    print("KERNEL_OK")
</pallas_src>

<mosaic_0001>
module attributes {stable_mosaic.version = 11 : i64} {
  func.func @_resplus_kernel(%arg0: i32, %arg1: memref<8x256xf32, #tpu.memory_space<vmem>>, %arg2: memref<4x8x1xf32, #tpu.memory_space<vmem>>, %arg3: memref<2x36xf32, #tpu.memory_space<vmem>>, %arg4: memref<2x1xf32, #tpu.memory_space<vmem>>, %arg5: memref<1024x512xf32, #tpu.memory_space<vmem>>, %arg6: memref<1x512xf32, #tpu.memory_space<vmem>>, %arg7: memref<4x36xf32, #tpu.memory_space<vmem>>, %arg8: memref<4x1xf32, #tpu.memory_space<vmem>>, %arg9: memref<9x256xf32, #tpu.memory_space<vmem>>, %arg10: memref<8x256xf32, #tpu.memory_space<vmem>>) attributes {dimension_semantics = [#tpu.dimension_semantics<parallel>], iteration_bounds = array<i64: 1>, scalar_prefetch = 0 : i64, scratch_operands = 0 : i64, tpu.core_type = #tpu.core_type<tc>, window_params = [{transform_indices = @transform_0, window_bounds = array<i64: 8, 256>}, {pipeline_mode = #tpu.pipeline_mode<synchronous>, transform_indices = @transform_1, window_bounds = array<i64: 4, 8, 1>}, {pipeline_mode = #tpu.pipeline_mode<synchronous>, transform_indices = @transform_2, window_bounds = array<i64: 2, 36>}, {pipeline_mode = #tpu.pipeline_mode<synchronous>, transform_indices = @transform_3, window_bounds = array<i64: 2, 1>}, {pipeline_mode = #tpu.pipeline_mode<synchronous>, transform_indices = @transform_4, window_bounds = array<i64: 1024, 512>}, {pipeline_mode = #tpu.pipeline_mode<synchronous>, transform_indices = @transform_5, window_bounds = array<i64: 1, 512>}, {pipeline_mode = #tpu.pipeline_mode<synchronous>, transform_indices = @transform_6, window_bounds = array<i64: 4, 36>}, {pipeline_mode = #tpu.pipeline_mode<synchronous>, transform_indices = @transform_7, window_bounds = array<i64: 4, 1>}, {pipeline_mode = #tpu.pipeline_mode<synchronous>, transform_indices = @transform_8, window_bounds = array<i64: 9, 256>}, {transform_indices = @transform_9, window_bounds = array<i64: 8, 256>}]} {
    %c0 = arith.constant 0 : index
    %c0_0 = arith.constant 0 : index
    %0 = vector.load %arg1[%c0, %c0_0] : memref<8x256xf32, #tpu.memory_space<vmem>>, vector<8x256xf32>
    %c0_1 = arith.constant 0 : index
    %c0_2 = arith.constant 0 : index
    %c0_3 = arith.constant 0 : index
    %1 = vector.load %arg2[%c0_1, %c0_2, %c0_3] : memref<4x8x1xf32, #tpu.memory_space<vmem>>, vector<1x8x1xf32>
    %2 = vector.shape_cast %1 : vector<1x8x1xf32> to vector<8x1xf32>
    %c1 = arith.constant 1 : index
    %c0_4 = arith.constant 0 : index
    %c0_5 = arith.constant 0 : index
    %3 = vector.load %arg2[%c1, %c0_4, %c0_5] : memref<4x8x1xf32, #tpu.memory_space<vmem>>, vector<1x8x1xf32>
    %4 = vector.shape_cast %3 : vector<1x8x1xf32> to vector<8x1xf32>
    %c2 = arith.constant 2 : index
    %c0_6 = arith.constant 0 : index
    %c0_7 = arith.constant 0 : index
    %5 = vector.load %arg2[%c2, %c0_6, %c0_7] : memref<4x8x1xf32, #tpu.memory_space<vmem>>, vector<1x8x1xf32>
    %6 = vector.shape_cast %5 : vector<1x8x1xf32> to vector<8x1xf32>
    %c3 = arith.constant 3 : index
    %c0_8 = arith.constant 0 : index
    %c0_9 = arith.constant 0 : index
    %7 = vector.load %arg2[%c3, %c0_8, %c0_9] : memref<4x8x1xf32, #tpu.memory_space<vmem>>, vector<1x8x1xf32>
    %8 = vector.shape_cast %7 : vector<1x8x1xf32> to vector<8x1xf32>
    %9 = vector.broadcast %2 : vector<8x1xf32> to vector<8x256xf32>
    %10 = arith.mulf %0, %9 : vector<8x256xf32>
    %11 = vector.broadcast %4 : vector<8x1xf32> to vector<8x256xf32>
    %12 = arith.addf %10, %11 : vector<8x256xf32>
    %cst = arith.constant 0.000000e+00 : f32
    %13 = vector.broadcast %cst : f32 to vector<8x256xf32>
    %14 = arith.maximumf %12, %13 : vector<8x256xf32>
    %c17_i32 = arith.constant 17 : i32
    %15 = tpu.dynamic_rotate %14 by %c17_i32 dim 1 : vector<8x256xf32>, i32 -> vector<8x256xf32>
    %c0_10 = arith.constant 0 : index
    %c0_11 = arith.constant 0 : index
    %16 = vector.load %arg9[%c0_10, %c0_11] : memref<9x256xf32, #tpu.memory_space<vmem>>, vector<1x256xf32>
    %17 = vector.broadcast %16 : vector<1x256xf32> to vector<8x256xf32>
    %18 = arith.mulf %15, %17 : vector<8x256xf32>
    %c16_i32 = arith.constant 16 : i32
    %19 = tpu.dynamic_rotate %14 by %c16_i32 dim 1 : vector<8x256xf32>, i32 -> vector<8x256xf32>
    %c1_12 = arith.constant 1 : index
    %c0_13 = arith.constant 0 : index
    %20 = vector.load %arg9[%c1_12, %c0_13] : memref<9x256xf32, #tpu.memory_space<vmem>>, vector<1x256xf32>
    %21 = vector.broadcast %20 : vector<1x256xf32> to vector<8x256xf32>
    %22 = arith.mulf %19, %21 : vector<8x256xf32>
    %c15_i32 = arith.constant 15 : i32
    %23 = tpu.dynamic_rotate %14 by %c15_i32 dim 1 : vector<8x256xf32>, i32 -> vector<8x256xf32>
    %c2_14 = arith.constant 2 : index
    %c0_15 = arith.constant 0 : index
    %24 = vector.load %arg9[%c2_14, %c0_15] : memref<9x256xf32, #tpu.memory_space<vmem>>, vector<1x256xf32>
    %25 = vector.broadcast %24 : vector<1x256xf32> to vector<8x256xf32>
    %26 = arith.mulf %23, %25 : vector<8x256xf32>
    %c1_i32 = arith.constant 1 : i32
    %27 = tpu.dynamic_rotate %14 by %c1_i32 dim 1 : vector<8x256xf32>, i32 -> vector<8x256xf32>
    %c3_16 = arith.constant 3 : index
    %c0_17 = arith.constant 0 : index
    %28 = vector.load %arg9[%c3_16, %c0_17] : memref<9x256xf32, #tpu.memory_space<vmem>>, vector<1x256xf32>
    %29 = vector.broadcast %28 : vector<1x256xf32> to vector<8x256xf32>
    %30 = arith.mulf %27, %29 : vector<8x256xf32>
    %c255_i32 = arith.constant 255 : i32
    %31 = tpu.dynamic_rotate %14 by %c255_i32 dim 1 : vector<8x256xf32>, i32 -> vector<8x256xf32>
    %c5 = arith.constant 5 : index
    %c0_18 = arith.constant 0 : index
    %32 = vector.load %arg9[%c5, %c0_18] : memref<9x256xf32, #tpu.memory_space<vmem>>, vector<1x256xf32>
    %33 = vector.broadcast %32 : vector<1x256xf32> to vector<8x256xf32>
    %34 = arith.mulf %31, %33 : vector<8x256xf32>
    %c241_i32 = arith.constant 241 : i32
    %35 = tpu.dynamic_rotate %14 by %c241_i32 dim 1 : vector<8x256xf32>, i32 -> vector<8x256xf32>
    %c6 = arith.constant 6 : index
    %c0_19 = arith.constant 0 : index
    %36 = vector.load %arg9[%c6, %c0_19] : memref<9x256xf32, #tpu.memory_space<vmem>>, vector<1x256xf32>
    %37 = vector.broadcast %36 : vector<1x256xf32> to vector<8x256xf32>
    %38 = arith.mulf %35, %37 : vector<8x256xf32>
    %c240_i32 = arith.constant 240 : i32
    %39 = tpu.dynamic_rotate %14 by %c240_i32 dim 1 : vector<8x256xf32>, i32 -> vector<8x256xf32>
    %c7 = arith.constant 7 : index
    %c0_20 = arith.constant 0 : index
    %40 = vector.load %arg9[%c7, %c0_20] : memref<9x256xf32, #tpu.memory_space<vmem>>, vector<1x256xf32>
    %41 = vector.broadcast %40 : vector<1x256xf32> to vector<8x256xf32>
    %42 = arith.mulf %39, %41 : vector<8x256xf32>
    %c239_i32 = arith.constant 239 : i32
    %43 = tpu.dynamic_rotate %14 by %c239_i32 dim 1 : vector<8x256xf32>, i32 -> vector<8x256xf32>
    %c8 = arith.constant 8 : index
    %c0_21 = arith.constant 0 : index
    %44 = vector.load %arg9[%c8, %c0_21] : memref<9x256xf32, #tpu.memory_space<vmem>>, vector<1x256xf32>
    %45 = vector.broadcast %44 : vector<1x256xf32> to vector<8x256xf32>
    %46 = arith.mulf %43, %45 : vector<8x256xf32>
    %cst_22 = arith.constant 0.000000e+00 : f32
    %47 = vector.broadcast %cst_22 : f32 to vector<8x256xf32>
    %48 = arith.maximumf %0, %47 : vector<8x256xf32>
    %49 = vector.broadcast %2 : vector<8x1xf32> to vector<8x256xf32>
    %50 = arith.mulf %48, %49 : vector<8x256xf32>
    %51 = vector.broadcast %4 : vector<8x1xf32> to vector<8x256xf32>
    %52 = arith.addf %50, %51 : vector<8x256xf32>
    %53 = vector.extract_strided_slice %52 {offsets = [0, 0], sizes = [1, 256], strides = [1, 1]} : vector<8x256xf32> to vector<1x256xf32>
    %54 = vector.extract_strided_slice %52 {offsets = [1, 0], sizes = [1, 256], strides = [1, 1]} : vector<8x256xf32> to vector<1x256xf32>
    %55 = vector.extract_strided_slice %52 {offsets = [2, 0], sizes = [1, 256], strides = [1, 1]} : vector<8x256xf32> to vector<1x256xf32>
    %56 = vector.extract_strided_slice %52 {offsets = [3, 0], sizes = [1, 256], strides = [1, 1]} : vector<8x256xf32> to vector<1x256xf32>
    %57 = tpu.concatenate %53, %54, %55, %56 in 1 : vector<1x256xf32>, vector<1x256xf32>, vector<1x256xf32>, vector<1x256xf32> -> vector<1x1024xf32>
    %58 = vector.extract_strided_slice %52 {offsets = [4, 0], sizes = [1, 256], strides = [1, 1]} : vector<8x256xf32> to vector<1x256xf32>
    %59 = vector.extract_strided_slice %52 {offsets = [5, 0], sizes = [1, 256], strides = [1, 1]} : vector<8x256xf32> to vector<1x256xf32>
    %60 = vector.extract_strided_slice %52 {offsets = [6, 0], sizes = [1, 256], strides = [1, 1]} : vector<8x256xf32> to vector<1x256xf32>
    %61 = vector.extract_strided_slice %52 {offsets = [7, 0], sizes = [1, 256], strides = [1, 1]} : vector<8x256xf32> to vector<1x256xf32>
    %62 = tpu.concatenate %58, %59, %60, %61 in 1 : vector<1x256xf32>, vector<1x256xf32>, vector<1x256xf32>, vector<1x256xf32> -> vector<1x1024xf32>
    %63 = tpu.concatenate %57, %62 in 0 : vector<1x1024xf32>, vector<1x1024xf32> -> vector<2x1024xf32>
    %c0_23 = arith.constant 0 : index
    %c0_24 = arith.constant 0 : index
    %64 = vector.load %arg5[%c0_23, %c0_24] : memref<1024x512xf32, #tpu.memory_space<vmem>>, vector<1024x512xf32>
    %cst_25 = arith.constant dense<0.000000e+00> : vector<2x512xf32>
    %65 = tpu.matmul %63, %64, %cst_25 {dimension_numbers = #tpu.dot_dimension_numbers<[1], [0], [0], [1], [0, 0, 1, 1], [], []>} : vector<2x1024xf32>, vector<1024x512xf32>, vector<2x512xf32> -> vector<2x512xf32>
    %c0_26 = arith.constant 0 : index
    %c0_27 = arith.constant 0 : index
    %66 = vector.load %arg6[%c0_26, %c0_27] : memref<1x512xf32, #tpu.memory_space<vmem>>, vector<1x512xf32>
    %67 = vector.broadcast %66 : vector<1x512xf32> to vector<2x512xf32>
    %68 = arith.addf %65, %67 : vector<2x512xf32>
    %69 = vector.extract_strided_slice %18 {offsets = [0, 0], sizes = [4, 256], strides = [1, 1]} : vector<8x256xf32> to vector<4x256xf32>
    %70 = vector.extract_strided_slice %22 {offsets = [0, 0], sizes = [4, 256], strides = [1, 1]} : vector<8x256xf32> to vector<4x256xf32>
    %71 = vector.extract_strided_slice %26 {offsets = [0, 0], sizes = [4, 256], strides = [1, 1]} : vector<8x256xf32> to vector<4x256xf32>
    %72 = vector.extract_strided_slice %30 {offsets = [0, 0], sizes = [4, 256], strides = [1, 1]} : vector<8x256xf32> to vector<4x256xf32>
    %73 = vector.extract_strided_slice %14 {offsets = [0, 0], sizes = [4, 256], strides = [1, 1]} : vector<8x256xf32> to vector<4x256xf32>
    %74 = vector.extract_strided_slice %34 {offsets = [0, 0], sizes = [4, 256], strides = [1, 1]} : vector<8x256xf32> to vector<4x256xf32>
    %75 = vector.extract_strided_slice %38 {offsets = [0, 0], sizes = [4, 256], strides = [1, 1]} : vector<8x256xf32> to vector<4x256xf32>
    %76 = vector.extract_strided_slice %42 {offsets = [0, 0], sizes = [4, 256], strides = [1, 1]} : vector<8x256xf32> to vector<4x256xf32>
    %77 = vector.extract_strided_slice %46 {offsets = [0, 0], sizes = [4, 256], strides = [1, 1]} : vector<8x256xf32> to vector<4x256xf32>
    %78 = tpu.concatenate %69, %70, %71, %72, %73, %74, %75, %76, %77 in 0 : vector<4x256xf32>, vector<4x256xf32>, vector<4x256xf32>, vector<4x256xf32>, vector<4x256xf32>, vector<4x256xf32>, vector<4x256xf32>, vector<4x256xf32>, vector<4x256xf32> -> vector<36x256xf32>
    %c0_28 = arith.constant 0 : index
    %c0_29 = arith.constant 0 : index
    %79 = vector.load %arg3[%c0_28, %c0_29] : memref<2x36xf32, #tpu.memory_space<vmem>>, vector<2x36xf32>
    %cst_30 = arith.constant dense<0.000000e+00> : vector<2x256xf32>
    %80 = tpu.matmul %79, %78, %cst_30 {dimension_numbers = #tpu.dot_dimension_numbers<[1], [0], [0], [1], [0, 0, 1, 1], [], []>} : vector<2x36xf32>, vector<36x256xf32>, vector<2x256xf32> -> vector<2x256xf32>
    %c0_31 = arith.constant 0 : index
    %c0_32 = arith.constant 0 : index
    %81 = vector.load %arg4[%c0_31, %c0_32] : memref<2x1xf32, #tpu.memory_space<vmem>>, vector<2x1xf32>
    %82 = vector.broadcast %81 : vector<2x1xf32> to vector<2x256xf32>
    %83 = arith.addf %80, %82 : vector<2x256xf32>
    %84 = vector.extract_strided_slice %68 {offsets = [0, 0], sizes = [1, 256], strides = [1, 1]} : vector<2x512xf32> to vector<1x256xf32>
    %85 = vector.extract_strided_slice %68 {offsets = [0, 256], sizes = [1, 256], strides = [1, 1]} : vector<2x512xf32> to vector<1x256xf32>
    %86 = tpu.concatenate %84, %85 in 0 : vector<1x256xf32>, vector<1x256xf32> -> vector<2x256xf32>
    %87 = tpu.concatenate %83, %86 in 0 : vector<2x256xf32>, vector<2x256xf32> -> vector<4x256xf32>
    %88 = vector.extract_strided_slice %18 {offsets = [4, 0], sizes = [4, 256], strides = [1, 1]} : vector<8x256xf32> to vector<4x256xf32>
    %89 = vector.extract_strided_slice %22 {offsets = [4, 0], sizes = [4, 256], strides = [1, 1]} : vector<8x256xf32> to vector<4x256xf32>
    %90 = vector.extract_strided_slice %26 {offsets = [4, 0], sizes = [4, 256], strides = [1, 1]} : vector<8x256xf32> to vector<4x256xf32>
    %91 = vector.extract_strided_slice %30 {offsets = [4, 0], sizes = [4, 256], strides = [1, 1]} : vector<8x256xf32> to vector<4x256xf32>
    %92 = vector.extract_strided_slice %14 {offsets = [4, 0], sizes = [4, 256], strides = [1, 1]} : vector<8x256xf32> to vector<4x256xf32>
    %93 = vector.extract_strided_slice %34 {offsets = [4, 0], sizes = [4, 256], strides = [1, 1]} : vector<8x256xf32> to vector<4x256xf32>
    %94 = vector.extract_strided_slice %38 {offsets = [4, 0], sizes = [4, 256], strides = [1, 1]} : vector<8x256xf32> to vector<4x256xf32>
    %95 = vector.extract_strided_slice %42 {offsets = [4, 0], sizes = [4, 256], strides = [1, 1]} : vector<8x256xf32> to vector<4x256xf32>
    %96 = vector.extract_strided_slice %46 {offsets = [4, 0], sizes = [4, 256], strides = [1, 1]} : vector<8x256xf32> to vector<4x256xf32>
    %97 = tpu.concatenate %88, %89, %90, %91, %92, %93, %94, %95, %96 in 0 : vector<4x256xf32>, vector<4x256xf32>, vector<4x256xf32>, vector<4x256xf32>, vector<4x256xf32>, vector<4x256xf32>, vector<4x256xf32>, vector<4x256xf32>, vector<4x256xf32> -> vector<36x256xf32>
    %c0_33 = arith.constant 0 : index
    %c0_34 = arith.constant 0 : index
    %98 = vector.load %arg3[%c0_33, %c0_34] : memref<2x36xf32, #tpu.memory_space<vmem>>, vector<2x36xf32>
    %cst_35 = arith.constant dense<0.000000e+00> : vector<2x256xf32>
    %99 = tpu.matmul %98, %97, %cst_35 {dimension_numbers = #tpu.dot_dimension_numbers<[1], [0], [0], [1], [0, 0, 1, 1], [], []>} : vector<2x36xf32>, vector<36x256xf32>, vector<2x256xf32> -> vector<2x256xf32>
    %c0_36 = arith.constant 0 : index
    %c0_37 = arith.constant 0 : index
    %100 = vector.load %arg4[%c0_36, %c0_37] : memref<2x1xf32, #tpu.memory_space<vmem>>, vector<2x1xf32>
    %101 = vector.broadcast %100 : vector<2x1xf32> to vector<2x256xf32>
    %102 = arith.addf %99, %101 : vector<2x256xf32>
    %103 = vector.extract_strided_slice %68 {offsets = [1, 0], sizes = [1, 256], strides = [1, 1]} : vector<2x512xf32> to vector<1x256xf32>
    %104 = vector.extract_strided_slice %68 {offsets = [1, 256], sizes = [1, 256], strides = [1, 1]} : vector<2x512xf32> to vector<1x256xf32>
    %105 = tpu.concatenate %103, %104 in 0 : vector<1x256xf32>, vector<1x256xf32> -> vector<2x256xf32>
    %106 = tpu.concatenate %102, %105 in 0 : vector<2x256xf32>, vector<2x256xf32> -> vector<4x256xf32>
    %107 = tpu.concatenate %87, %106 in 0 : vector<4x256xf32>, vector<4x256xf32> -> vector<8x256xf32>
    %108 = vector.broadcast %6 : vector<8x1xf32> to vector<8x256xf32>
    %109 = arith.mulf %107, %108 : vector<8x256xf32>
    %110 = vector.broadcast %8 : vector<8x1xf32> to vector<8x256xf32>
    %111 = arith.addf %109, %110 : vector<8x256xf32>
    %cst_38 = arith.constant 0.000000e+00 : f32
    %112 = vector.broadcast %cst_38 : f32 to vector<8x256xf32>
    %113 = arith.maximumf %111, %112 : vector<8x256xf32>
    %c17_i32_39 = arith.constant 17 : i32
    %114 = tpu.dynamic_rotate %113 by %c17_i32_39 dim 1 : vector<8x256xf32>, i32 -> vector<8x256xf32>
    %c0_40 = arith.constant 0 : index
    %c0_41 = arith.constant 0 : index
    %115 = vector.load %arg9[%c0_40, %c0_41] : memref<9x256xf32, #tpu.memory_space<vmem>>, vector<1x256xf32>
    %116 = vector.broadcast %115 : vector<1x256xf32> to vector<8x256xf32>
    %117 = arith.mulf %114, %116 : vector<8x256xf32>
    %c16_i32_42 = arith.constant 16 : i32
    %118 = tpu.dynamic_rotate %113 by %c16_i32_42 dim 1 : vector<8x256xf32>, i32 -> vector<8x256xf32>
    %c1_43 = arith.constant 1 : index
    %c0_44 = arith.constant 0 : index
    %119 = vector.load %arg9[%c1_43, %c0_44] : memref<9x256xf32, #tpu.memory_space<vmem>>, vector<1x256xf32>
    %120 = vector.broadcast %119 : vector<1x256xf32> to vector<8x256xf32>
    %121 = arith.mulf %118, %120 : vector<8x256xf32>
    %c15_i32_45 = arith.constant 15 : i32
    %122 = tpu.dynamic_rotate %113 by %c15_i32_45 dim 1 : vector<8x256xf32>, i32 -> vector<8x256xf32>
    %c2_46 = arith.constant 2 : index
    %c0_47 = arith.constant 0 : index
    %123 = vector.load %arg9[%c2_46, %c0_47] : memref<9x256xf32, #tpu.memory_space<vmem>>, vector<1x256xf32>
    %124 = vector.broadcast %123 : vector<1x256xf32> to vector<8x256xf32>
    %125 = arith.mulf %122, %124 : vector<8x256xf32>
    %c1_i32_48 = arith.constant 1 : i32
    %126 = tpu.dynamic_rotate %113 by %c1_i32_48 dim 1 : vector<8x256xf32>, i32 -> vector<8x256xf32>
    %c3_49 = arith.constant 3 : index
    %c0_50 = arith.constant 0 : index
    %127 = vector.load %arg9[%c3_49, %c0_50] : memref<9x256xf32, #tpu.memory_space<vmem>>, vector<1x256xf32>
    %128 = vector.broadcast %127 : vector<1x256xf32> to vector<8x256xf32>
    %129 = arith.mulf %126, %128 : vector<8x256xf32>
    %c255_i32_51 = arith.constant 255 : i32
    %130 = tpu.dynamic_rotate %113 by %c255_i32_51 dim 1 : vector<8x256xf32>, i32 -> vector<8x256xf32>
    %c5_52 = arith.constant 5 : index
    %c0_53 = arith.constant 0 : index
    %131 = vector.load %arg9[%c5_52, %c0_53] : memref<9x256xf32, #tpu.memory_space<vmem>>, vector<1x256xf32>
    %132 = vector.broadcast %131 : vector<1x256xf32> to vector<8x256xf32>
    %133 = arith.mulf %130, %132 : vector<8x256xf32>
    %c241_i32_54 = arith.constant 241 : i32
    %134 = tpu.dynamic_rotate %113 by %c241_i32_54 dim 1 : vector<8x256xf32>, i32 -> vector<8x256xf32>
    %c6_55 = arith.constant 6 : index
    %c0_56 = arith.constant 0 : index
    %135 = vector.load %arg9[%c6_55, %c0_56] : memref<9x256xf32, #tpu.memory_space<vmem>>, vector<1x256xf32>
    %136 = vector.broadcast %135 : vector<1x256xf32> to vector<8x256xf32>
    %137 = arith.mulf %134, %136 : vector<8x256xf32>
    %c240_i32_57 = arith.constant 240 : i32
    %138 = tpu.dynamic_rotate %113 by %c240_i32_57 dim 1 : vector<8x256xf32>, i32 -> vector<8x256xf32>
    %c7_58 = arith.constant 7 : index
    %c0_59 = arith.constant 0 : index
    %139 = vector.load %arg9[%c7_58, %c0_59] : memref<9x256xf32, #tpu.memory_space<vmem>>, vector<1x256xf32>
    %140 = vector.broadcast %139 : vector<1x256xf32> to vector<8x256xf32>
    %141 = arith.mulf %138, %140 : vector<8x256xf32>
    %c239_i32_60 = arith.constant 239 : i32
    %142 = tpu.dynamic_rotate %113 by %c239_i32_60 dim 1 : vector<8x256xf32>, i32 -> vector<8x256xf32>
    %c8_61 = arith.constant 8 : index
    %c0_62 = arith.constant 0 : index
    %143 = vector.load %arg9[%c8_61, %c0_62] : memref<9x256xf32, #tpu.memory_space<vmem>>, vector<1x256xf32>
    %144 = vector.broadcast %143 : vector<1x256xf32> to vector<8x256xf32>
    %145 = arith.mulf %142, %144 : vector<8x256xf32>
    %146 = vector.extract_strided_slice %117 {offsets = [0, 0], sizes = [4, 256], strides = [1, 1]} : vector<8x256xf32> to vector<4x256xf32>
    %147 = vector.extract_strided_slice %121 {offsets = [0, 0], sizes = [4, 256], strides = [1, 1]} : vector<8x256xf32> to vector<4x256xf32>
    %148 = vector.extract_strided_slice %125 {offsets = [0, 0], sizes = [4, 256], strides = [1, 1]} : vector<8x256xf32> to vector<4x256xf32>
    %149 = vector.extract_strided_slice %129 {offsets = [0, 0], sizes = [4, 256], strides = [1, 1]} : vector<8x256xf32> to vector<4x256xf32>
    %150 = vector.extract_strided_slice %113 {offsets = [0, 0], sizes = [4, 256], strides = [1, 1]} : vector<8x256xf32> to vector<4x256xf32>
    %151 = vector.extract_strided_slice %133 {offsets = [0, 0], sizes = [4, 256], strides = [1, 1]} : vector<8x256xf32> to vector<4x256xf32>
    %152 = vector.extract_strided_slice %137 {offsets = [0, 0], sizes = [4, 256], strides = [1, 1]} : vector<8x256xf32> to vector<4x256xf32>
    %153 = vector.extract_strided_slice %141 {offsets = [0, 0], sizes = [4, 256], strides = [1, 1]} : vector<8x256xf32> to vector<4x256xf32>
    %154 = vector.extract_strided_slice %145 {offsets = [0, 0], sizes = [4, 256], strides = [1, 1]} : vector<8x256xf32> to vector<4x256xf32>
    %155 = tpu.concatenate %146, %147, %148, %149, %150, %151, %152, %153, %154 in 0 : vector<4x256xf32>, vector<4x256xf32>, vector<4x256xf32>, vector<4x256xf32>, vector<4x256xf32>, vector<4x256xf32>, vector<4x256xf32>, vector<4x256xf32>, vector<4x256xf32> -> vector<36x256xf32>
    %c0_63 = arith.constant 0 : index
    %c0_64 = arith.constant 0 : index
    %156 = vector.load %arg7[%c0_63, %c0_64] : memref<4x36xf32, #tpu.memory_space<vmem>>, vector<4x36xf32>
    %cst_65 = arith.constant dense<0.000000e+00> : vector<4x256xf32>
    %157 = tpu.matmul %156, %155, %cst_65 {dimension_numbers = #tpu.dot_dimension_numbers<[1], [0], [0], [1], [0, 0, 1, 1], [], []>} : vector<4x36xf32>, vector<36x256xf32>, vector<4x256xf32> -> vector<4x256xf32>
    %c0_66 = arith.constant 0 : index
    %c0_67 = arith.constant 0 : index
    %158 = vector.load %arg8[%c0_66, %c0_67] : memref<4x1xf32, #tpu.memory_space<vmem>>, vector<4x1xf32>
    %159 = vector.broadcast %158 : vector<4x1xf32> to vector<4x256xf32>
    %160 = arith.addf %157, %159 : vector<4x256xf32>
    %161 = vector.extract_strided_slice %0 {offsets = [0, 0], sizes = [4, 256], strides = [1, 1]} : vector<8x256xf32> to vector<4x256xf32>
    %162 = arith.addf %160, %161 : vector<4x256xf32>
    %163 = vector.extract_strided_slice %117 {offsets = [4, 0], sizes = [4, 256], strides = [1, 1]} : vector<8x256xf32> to vector<4x256xf32>
    %164 = vector.extract_strided_slice %121 {offsets = [4, 0], sizes = [4, 256], strides = [1, 1]} : vector<8x256xf32> to vector<4x256xf32>
    %165 = vector.extract_strided_slice %125 {offsets = [4, 0], sizes = [4, 256], strides = [1, 1]} : vector<8x256xf32> to vector<4x256xf32>
    %166 = vector.extract_strided_slice %129 {offsets = [4, 0], sizes = [4, 256], strides = [1, 1]} : vector<8x256xf32> to vector<4x256xf32>
    %167 = vector.extract_strided_slice %113 {offsets = [4, 0], sizes = [4, 256], strides = [1, 1]} : vector<8x256xf32> to vector<4x256xf32>
    %168 = vector.extract_strided_slice %133 {offsets = [4, 0], sizes = [4, 256], strides = [1, 1]} : vector<8x256xf32> to vector<4x256xf32>
    %169 = vector.extract_strided_slice %137 {offsets = [4, 0], sizes = [4, 256], strides = [1, 1]} : vector<8x256xf32> to vector<4x256xf32>
    %170 = vector.extract_strided_slice %141 {offsets = [4, 0], sizes = [4, 256], strides = [1, 1]} : vector<8x256xf32> to vector<4x256xf32>
    %171 = vector.extract_strided_slice %145 {offsets = [4, 0], sizes = [4, 256], strides = [1, 1]} : vector<8x256xf32> to vector<4x256xf32>
    %172 = tpu.concatenate %163, %164, %165, %166, %167, %168, %169, %170, %171 in 0 : vector<4x256xf32>, vector<4x256xf32>, vector<4x256xf32>, vector<4x256xf32>, vector<4x256xf32>, vector<4x256xf32>, vector<4x256xf32>, vector<4x256xf32>, vector<4x256xf32> -> vector<36x256xf32>
    %c0_68 = arith.constant 0 : index
    %c0_69 = arith.constant 0 : index
    %173 = vector.load %arg7[%c0_68, %c0_69] : memref<4x36xf32, #tpu.memory_space<vmem>>, vector<4x36xf32>
    %cst_70 = arith.constant dense<0.000000e+00> : vector<4x256xf32>
    %174 = tpu.matmul %173, %172, %cst_70 {dimension_numbers = #tpu.dot_dimension_numbers<[1], [0], [0], [1], [0, 0, 1, 1], [], []>} : vector<4x36xf32>, vector<36x256xf32>, vector<4x256xf32> -> vector<4x256xf32>
    %c0_71 = arith.constant 0 : index
    %c0_72 = arith.constant 0 : index
    %175 = vector.load %arg8[%c0_71, %c0_72] : memref<4x1xf32, #tpu.memory_space<vmem>>, vector<4x1xf32>
    %176 = vector.broadcast %175 : vector<4x1xf32> to vector<4x256xf32>
    %177 = arith.addf %174, %176 : vector<4x256xf32>
    %178 = vector.extract_strided_slice %0 {offsets = [4, 0], sizes = [4, 256], strides = [1, 1]} : vector<8x256xf32> to vector<4x256xf32>
    %179 = arith.addf %177, %178 : vector<4x256xf32>
    %180 = tpu.concatenate %162, %179 in 0 : vector<4x256xf32>, vector<4x256xf32> -> vector<8x256xf32>
    %c0_73 = arith.constant 0 : index
    %c0_74 = arith.constant 0 : index
    %181 = vector.load %arg10[%c0_73, %c0_74] : memref<8x256xf32, #tpu.memory_space<vmem>>, vector<8x256xf32>
    tpu.vector_store %arg10[%c0_73, %c0_74], %180 {strides = array<i32>} : memref<8x256xf32, #tpu.memory_space<vmem>>, vector<8x256xf32>,
    return
  }
  func.func @transform_0(%arg0: i32) -> (i32, i32) {
    %c0_i32 = arith.constant 0 : i32
    %c0_i32_0 = arith.constant 0 : i32
    return %arg0, %c0_i32 : i32, i32
  }
  func.func @transform_1(%arg0: i32) -> (i32, i32, i32) {
    %c0_i32 = arith.constant 0 : i32
    %c0_i32_0 = arith.constant 0 : i32
    %c0_i32_1 = arith.constant 0 : i32
    %c0_i32_2 = arith.constant 0 : i32
    return %c0_i32, %c0_i32_0, %c0_i32_1 : i32, i32, i32
  }
  func.func @transform_2(%arg0: i32) -> (i32, i32) {
    %c0_i32 = arith.constant 0 : i32
    %c0_i32_0 = arith.constant 0 : i32
    %c0_i32_1 = arith.constant 0 : i32
    return %c0_i32, %c0_i32_0 : i32, i32
  }
  func.func @transform_3(%arg0: i32) -> (i32, i32) {
    %c0_i32 = arith.constant 0 : i32
    %c0_i32_0 = arith.constant 0 : i32
    %c0_i32_1 = arith.constant 0 : i32
    return %c0_i32, %c0_i32_0 : i32, i32
  }
  func.func @transform_4(%arg0: i32) -> (i32, i32) {
    %c0_i32 = arith.constant 0 : i32
    %c0_i32_0 = arith.constant 0 : i32
    %c0_i32_1 = arith.constant 0 : i32
    return %c0_i32, %c0_i32_0 : i32, i32
  }
  func.func @transform_5(%arg0: i32) -> (i32, i32) {
    %c0_i32 = arith.constant 0 : i32
    %c0_i32_0 = arith.constant 0 : i32
    %c0_i32_1 = arith.constant 0 : i32
    return %c0_i32, %c0_i32_0 : i32, i32
  }
  func.func @transform_6(%arg0: i32) -> (i32, i32) {
    %c0_i32 = arith.constant 0 : i32
    %c0_i32_0 = arith.constant 0 : i32
    %c0_i32_1 = arith.constant 0 : i32
    return %c0_i32, %c0_i32_0 : i32, i32
  }
  func.func @transform_7(%arg0: i32) -> (i32, i32) {
    %c0_i32 = arith.constant 0 : i32
    %c0_i32_0 = arith.constant 0 : i32
    %c0_i32_1 = arith.constant 0 : i32
    return %c0_i32, %c0_i32_0 : i32, i32
  }
  func.func @transform_8(%arg0: i32) -> (i32, i32) {
    %c0_i32 = arith.constant 0 : i32
    %c0_i32_0 = arith.constant 0 : i32
    %c0_i32_1 = arith.constant 0 : i32
    return %c0_i32, %c0_i32_0 : i32, i32
  }
  func.func @transform_9(%arg0: i32) -> (i32, i32) {
    %c0_i32 = arith.constant 0 : i32
    %c0_i32_0 = arith.constant 0 : i32
    return %arg0, %c0_i32 : i32, i32
  }
}

</mosaic_0001>

<bundles_post_ra>
// kernel: tpu_custom_call.1
= control target key start
LH: loop header
LB: loop body
LE: loop exit
PB: predicated region body
PF: predicated region fallthrough
CT: control target
= control target key end

     0   :  { %14 = vsyncpa [#allocation3], 0  ;;  %s2807_s0 = inlined_call_operand.hbm [shape: f32[8,256], index: 0, kind: input, shape index: {}]   ;;  %s2808_s1 = inlined_call_operand.vmem [shape: f32[4,8,1], index: 1, kind: input, shape index: {}]   ;;  %s2809_s2 = inlined_call_operand.hbm [shape: f32[2,36], index: 2, kind: input, shape index: {}]   ;;  %s2810_s3 = inlined_call_operand.vmem [shape: f32[2,1], index: 3, kind: input, shape index: {}]   ;;  %s2811_s4 = inlined_call_operand.hbm [shape: f32[1024,512], index: 4, kind: input, shape index: {}]   ;;  %s2812_s5 = inlined_call_operand.hbm [shape: f32[1,512], index: 5, kind: input, shape index: {}]   ;;  %s2813_s6 = inlined_call_operand.hbm [shape: f32[4,36], index: 6, kind: input, shape index: {}]   ;;  %s2814_s7 = inlined_call_operand.vmem [shape: f32[4,1], index: 7, kind: input, shape index: {}]   ;;  %s2815_s8 = inlined_call_operand.hbm [shape: f32[9,256], index: 8, kind: input, shape index: {}]   ;;  %s2816_s9 = inlined_call_operand.hbm [shape: f32[8,256], index: 9, kind: output, shape index: {}]  }
   0x1   :  { %15 = vsyncpa [#allocation6], 0 }
   0x2   :  { %16 = vsyncpa [#allocation9], 0 }
   0x3   :  { %17 = vsyncpa [#allocation12], 0 }
   0x4   :  { %18 = vsyncpa [#allocation4], 0  ;;  %s2258_s30 = smov [#allocation5]   ;;  %s2259_s11 = smov [#allocation8]  }
   0x5   :  { %s37_s10 = sshll.u32 %s2258_s30, 4  ;;  %s61_s12 = sshll.u32 %s2259_s11, 4  ;;  %s38_s10 = int_to_ptr.vmem [resolvable:$true] %s37_s10  ;;  %s62_s12 = int_to_ptr.vmem [resolvable:$true] %s61_s12 }
   0x6   :  { %s2116_s13 = scalar_lea.vmem %s38_s10, 32  ;;  %p2121_p1 = scmp.lt.s32.totalorder %s38_s10, %s38_s10 }
   0x7   :  { %p2117_p0 = scmp.ne.s32.totalorder %s38_s10, %s2116_s13  ;;  %p2122_p2 = scmp.lt.s32.totalorder %s2116_s13, %s2116_s13 }
   0x9   :  { %p2123_p3 = por %p2122_p2, %p2121_p1 }
   0xb   :  { %p2124_p4 = pnand %p2123_p3, %p2117_p0 }
   0xd   :  { %2127 = shalt.err (!%p2124_p4)
}
   0xe   :  { %40 = dma.hbm_to_vmem [thread:$0]  %s2809_s2, 32, %s38_s10, [#allocation6]  }
   0xf   :  { %s2136_s16 = scalar_lea.vmem %s62_s12, 64  ;;  %p2141_p6 = scmp.lt.s32.totalorder %s62_s12, %s62_s12 }
  0x10   :  { %p2137_p5 = scmp.ne.s32.totalorder %s62_s12, %s2136_s16  ;;  %p2142_p7 = scmp.lt.s32.totalorder %s2136_s16, %s2136_s16 }
  0x12   :  { %p2143_p8 = por %p2142_p7, %p2141_p6 }
  0x14   :  { %p2144_p9 = pnand %p2143_p8, %p2137_p5 }
  0x16   :  { %2147 = shalt.err (!%p2144_p9)
}
  0x17   :  { %64 = dma.hbm_to_vmem [thread:$0]  %s2812_s5, 64, %s62_s12, [#allocation9]  }
  0x18   :  { %s2260_s19 = smov [#allocation2]   ;;  %s2261_s21 = smov [#allocation7]  }
  0x19   :  { %s25_s20 = sshll.u32 %s2260_s19, 4  ;;  %s48_s22 = sshll.u32 %s2261_s21, 4  ;;  %s26_s20 = int_to_ptr.vmem [resolvable:$true] %s25_s20  ;;  %s49_s22 = int_to_ptr.vmem [resolvable:$true] %s48_s22 }
  0x1a   :  { %s2156_s23 = scalar_lea.vmem %s26_s20, 256  ;;  %p2161_p11 = scmp.lt.s32.totalorder %s26_s20, %s26_s20 }
  0x1b   :  { %p2157_p10 = scmp.ne.s32.totalorder %s26_s20, %s2156_s23  ;;  %p2162_p12 = scmp.lt.s32.totalorder %s2156_s23, %s2156_s23 }
  0x1d   :  { %p2163_p13 = por %p2162_p12, %p2161_p11 }
  0x1f   :  { %p2164_p0 = pnand %p2163_p13, %p2157_p10 }
  0x21   :  { %2167 = shalt.err (!%p2164_p0)
}
  0x22   :  { %28 = dma.hbm_to_vmem [thread:$0]  %s2807_s0, 256, %s26_s20, [#allocation3]  }
  0x23   :  { %s2176_s25 = scalar_lea.vmem %s49_s22, 65536  ;;  %p2181_p2 = scmp.lt.s32.totalorder %s49_s22, %s49_s22 }
  0x24   :  { %p2177_p1 = scmp.ne.s32.totalorder %s49_s22, %s2176_s25  ;;  %p2182_p3 = scmp.lt.s32.totalorder %s2176_s25, %s2176_s25 }
  0x26   :  { %p2183_p4 = por %p2182_p3, %p2181_p2 }
  0x28   :  { %p2184_p5 = pnand %p2183_p4, %p2177_p1 }
  0x2a   :  { %2187 = shalt.err (!%p2184_p5)
}
  0x2b   :  { %s2262_s5 = smov 512   ;;  %s2263_s26 = smov 32  }
  0x2c   :  { %54 = dma.hbm_to_vmem [thread:$0]  %s2811_s4, 65536, %s49_s22, [#allocation6], %s2262_s5, %s2262_s5, %s2263_s26  }
  0x2d   :  { %s2264_s29 = smov [#allocation10]   ;;  %s2265_s10 = smov [#allocation11]  }
  0x2e   :  { %s71_s30 = sshll.u32 %s2264_s29, 4  ;;  %s82_s11 = sshll.u32 %s2265_s10, 4  ;;  %s72_s30 = int_to_ptr.vmem [resolvable:$true] %s71_s30  ;;  %s83_s11 = int_to_ptr.vmem [resolvable:$true] %s82_s11 }
  0x2f   :  { %s2196_s0 = scalar_lea.vmem %s72_s30, 64  ;;  %p2201_p7 = scmp.lt.s32.totalorder %s72_s30, %s72_s30 }
  0x30   :  { %p2197_p6 = scmp.ne.s32.totalorder %s72_s30, %s2196_s0  ;;  %p2202_p8 = scmp.lt.s32.totalorder %s2196_s0, %s2196_s0 }
  0x32   :  { %p2203_p9 = por %p2202_p8, %p2201_p7 }
  0x34   :  { %p2204_p10 = pnand %p2203_p9, %p2197_p6 }
  0x36   :  { %2207 = shalt.err (!%p2204_p10)
}
  0x37   :  { %74 = dma.hbm_to_vmem [thread:$0]  %s2813_s6, 64, %s72_s30, [#allocation9]  }
  0x38   :  { %s2216_s14 = scalar_lea.vmem %s83_s11, 512  ;;  %p2221_p12 = scmp.lt.s32.totalorder %s83_s11, %s83_s11 }
  0x39   :  { %p2217_p11 = scmp.ne.s32.totalorder %s83_s11, %s2216_s14  ;;  %p2222_p13 = scmp.lt.s32.totalorder %s2216_s14, %s2216_s14 }
  0x3b   :  { %p2223_p0 = por %p2222_p13, %p2221_p12 }
  0x3d   :  { %p2224_p1 = pnand %p2223_p0, %p2217_p11 }
  0x3f   :  { %2227 = shalt.err (!%p2224_p1)
}
  0x40   :  { %s2266_s4 = smov 256   ;;  %s2267_s15 = smov 16  }
  0x41   :  { %88 = dma.hbm_to_vmem [thread:$0]  %s2815_s8, 512, %s83_s11, [#allocation12], %s2266_s4, %s2266_s4, %s2267_s15  }
  0x42   :  { %2248 = dma.done.wait [#allocation3], 256  }
  0x43   :  { %2249 = vsyncadd [#allocation3], 4294967040 }
  0x44   :  { %2250 = dma.done.wait [#allocation6], 65568  }
  0x45   :  { %2251 = vsyncadd [#allocation6], 4294901728 }
  0x46   :  { %2252 = dma.done.wait [#allocation9], 128  }
  0x47   :  { %2253 = vsyncadd [#allocation9], 4294967168 }
  0x48   :  { %2254 = dma.done.wait [#allocation12], 512  }
  0x49   :  { %2255 = vsyncadd [#allocation12], 4294966784  ;;  %v2268_v0 = vmov 0   ;;  %v109_v1 = vld [vmem:[%s2808_s1] sm:$0xff]  ;;  %v2069_v2 = vld [vmem:[%s2808_s1 + $0x8] sm:$0xff]  ;;  %vm341_vm0 = vcmask 1040384  }
  0x4a   :  { %2104 = vset.pattern.permute.xlu0 %v2268_v0  ;;  %2105 = vset.pattern.permute.xlu1 %v2268_v0  ;;  %v411_v3 = vld [vmem:[#allocation7 + $0x1e8] sm:$0xff]  ;;  %v410_v4 = vld [vmem:[#allocation7 + $0x1e0] sm:$0xff]  ;;  %s2269_s8 = smov 113   ;;  %s2270_s21 = smov 111   ;;  %vm1476_vm8 = vcmask 1043456   ;;  %vm1492_vm10 = vcmask 293888  }
  0x4b   :  { %118 = vperm.xlu0 %2104, %v109_v1   ;;  %884 = vmatprep.subr.mxu0 %v411_v3  ;;  %v407_v5 = vld [vmem:[#allocation7 + $0x1c8] sm:$0xff]  ;;  %v406_v7 = vld [vmem:[#allocation7 + $0x1c0] sm:$0xff]  ;;  %s2271_s22 = smov 112   ;;  %s2272_s23 = smov 15   ;;  %vm1587_vm11 = vcmask 1041408  }
  0x4c   :  { %v539_v6 = vld [vmem:[#allocation7 + $0x5e8] sm:$0xff]  ;;  %885 = vmatpush1.msra.mxu0 %v410_v4  ;;  %v538_v8 = vld [vmem:[#allocation7 + $0x5e0] sm:$0xff]  ;;  %s2273_s2 = smov 127   ;;  %s2274_s24 = smov 17  }
  0x4d   :  { %955 = vmatprep.subr.mxu1 %v539_v6  ;;  %v403_v9 = vld [vmem:[#allocation7 + $0x1a8] sm:$0xff]  ;;  %886 = vmatprep.subr.mxu0 %v407_v5  ;;  %v402_v11 = vld [vmem:[#allocation7 + $0x1a0] sm:$0xff]  ;;  %s2275_s25 = smov 1  }
  0x4e   :  { %956 = vmatpush1.msra.mxu1 %v538_v8  ;;  %v535_v10 = vld [vmem:[#allocation7 + $0x5c8] sm:$0xff]  ;;  %v534_v12 = vld [vmem:[#allocation7 + $0x5c0] sm:$0xff]  ;;  %887 = vmatpush1.msra.mxu0 %v406_v7 }
  0x4f   :  { %957 = vmatprep.subr.mxu1 %v535_v10  ;;  %v399_v13 = vld [vmem:[#allocation7 + $0x188] sm:$0xff]  ;;  %125 = vperm.xlu0 %2104, %v2069_v2   ;;  %v398_v15 = vld [vmem:[#allocation7 + $0x180] sm:$0xff] }
  0x50   :  { %v531_v14 = vld [vmem:[#allocation7 + $0x5a8] sm:$0xff]  ;;  %888 = vmatprep.subr.mxu0 %v403_v9  ;;  %v530_v16 = vld [vmem:[#allocation7 + $0x5a0] sm:$0xff]  ;;  %958 = vmatpush1.msra.mxu1 %v534_v12 }
  0x51   :  { %889 = vmatpush1.msra.mxu0 %v402_v11  ;;  %v395_v17 = vld [vmem:[#allocation7 + $0x168] sm:$0xff]  ;;  %959 = vmatprep.subr.mxu1 %v531_v14  ;;  %v394_v19 = vld [vmem:[#allocation7 + $0x160] sm:$0xff] }
  0x52   :  { %v527_v18 = vld [vmem:[#allocation7 + $0x588] sm:$0xff]  ;;  %890 = vmatprep.subr.mxu0 %v399_v13  ;;  %v526_v20 = vld [vmem:[#allocation7 + $0x580] sm:$0xff]  ;;  %960 = vmatpush1.msra.mxu1 %v530_v16 }
  0x53   :  { %891 = vmatpush1.msra.mxu0 %v398_v15  ;;  %v391_v21 = vld [vmem:[#allocation7 + $0x148] sm:$0xff]  ;;  %961 = vmatprep.subr.mxu1 %v527_v18  ;;  %v390_v23 = vld [vmem:[#allocation7 + $0x140] sm:$0xff] }
  0x54   :  { %v523_v22 = vld [vmem:[#allocation7 + $0x568] sm:$0xff]  ;;  %892 = vmatprep.subr.mxu0 %v395_v17  ;;  %v522_v24 = vld [vmem:[#allocation7 + $0x560] sm:$0xff]  ;;  %962 = vmatpush1.msra.mxu1 %v526_v20 }
  0x55   :  { %893 = vmatpush1.msra.mxu0 %v394_v19  ;;  %v387_v25 = vld [vmem:[#allocation7 + $0x128] sm:$0xff]  ;;  %963 = vmatprep.subr.mxu1 %v523_v22  ;;  %v386_v27 = vld [vmem:[#allocation7 + $0x120] sm:$0xff] }
  0x56   :  { %v519_v26 = vld [vmem:[#allocation7 + $0x548] sm:$0xff]  ;;  %894 = vmatprep.subr.mxu0 %v391_v21  ;;  %v518_v28 = vld [vmem:[#allocation7 + $0x540] sm:$0xff]  ;;  %964 = vmatpush1.msra.mxu1 %v522_v24 }
  0x57   :  { %895 = vmatpush1.msra.mxu0 %v390_v23  ;;  %v383_v29 = vld [vmem:[#allocation7 + $0x108] sm:$0xff]  ;;  %965 = vmatprep.subr.mxu1 %v519_v26  ;;  %v382_v31 = vld [vmem:[#allocation7 + $0x100] sm:$0xff] }
  0x58   :  { %v515_v30 = vld [vmem:[#allocation7 + $0x528] sm:$0xff]  ;;  %896 = vmatprep.subr.mxu0 %v387_v25  ;;  %v514_v32 = vld [vmem:[#allocation7 + $0x520] sm:$0xff]  ;;  %966 = vmatpush1.msra.mxu1 %v518_v28 }
  0x59   :  { %897 = vmatpush1.msra.mxu0 %v386_v27  ;;  %v379_v33 = vld [vmem:[#allocation7 + $0xe8] sm:$0xff]  ;;  %967 = vmatprep.subr.mxu1 %v515_v30  ;;  %v378_v35 = vld [vmem:[#allocation7 + $0xe0] sm:$0xff] }
  0x5a   :  { %v511_v34 = vld [vmem:[#allocation7 + $0x508] sm:$0xff]  ;;  %898 = vmatprep.subr.mxu0 %v383_v29  ;;  %v510_v36 = vld [vmem:[#allocation7 + $0x500] sm:$0xff]  ;;  %968 = vmatpush1.msra.mxu1 %v514_v32 }
  0x5b   :  { %899 = vmatpush1.msra.mxu0 %v382_v31  ;;  %v375_v37 = vld [vmem:[#allocation7 + $0xc8] sm:$0xff]  ;;  %969 = vmatprep.subr.mxu1 %v511_v34  ;;  %v374_v39 = vld [vmem:[#allocation7 + $0xc0] sm:$0xff] }
  0x5c   :  { %v507_v38 = vld [vmem:[#allocation7 + $0x4e8] sm:$0xff]  ;;  %900 = vmatprep.subr.mxu0 %v379_v33  ;;  %v506_v40 = vld [vmem:[#allocation7 + $0x4e0] sm:$0xff]  ;;  %970 = vmatpush1.msra.mxu1 %v510_v36 }
  0x5d   :  { %901 = vmatpush1.msra.mxu0 %v378_v35  ;;  %v371_v41 = vld [vmem:[#allocation7 + $0xa8] sm:$0xff]  ;;  %971 = vmatprep.subr.mxu1 %v507_v38  ;;  %v370_v43 = vld [vmem:[#allocation7 + $0xa0] sm:$0xff] }
  0x5e   :  { %v503_v42 = vld [vmem:[#allocation7 + $0x4c8] sm:$0xff]  ;;  %902 = vmatprep.subr.mxu0 %v375_v37  ;;  %v502_v44 = vld [vmem:[#allocation7 + $0x4c0] sm:$0xff]  ;;  %972 = vmatpush1.msra.mxu1 %v506_v40 }
  0x5f   :  { %903 = vmatpush1.msra.mxu0 %v374_v39  ;;  %v367_v45 = vld [vmem:[#allocation7 + $0x88] sm:$0xff]  ;;  %973 = vmatprep.subr.mxu1 %v503_v42  ;;  %v366_v47 = vld [vmem:[#allocation7 + $0x80] sm:$0xff] }
  0x60   :  { %v499_v46 = vld [vmem:[#allocation7 + $0x4a8] sm:$0xff]  ;;  %904 = vmatprep.subr.mxu0 %v371_v41  ;;  %v498_v48 = vld [vmem:[#allocation7 + $0x4a0] sm:$0xff]  ;;  %974 = vmatpush1.msra.mxu1 %v502_v44 }
  0x61   :  { %905 = vmatpush1.msra.mxu0 %v370_v43  ;;  %v363_v49 = vld [vmem:[#allocation7 + $0x68] sm:$0xff]  ;;  %975 = vmatprep.subr.mxu1 %v499_v46  ;;  %v362_v51 = vld [vmem:[#allocation7 + $0x60] sm:$0xff] }
  0x62   :  { %v495_v50 = vld [vmem:[#allocation7 + $0x488] sm:$0xff]  ;;  %906 = vmatprep.subr.mxu0 %v367_v45  ;;  %v494_v52 = vld [vmem:[#allocation7 + $0x480] sm:$0xff]  ;;  %976 = vmatpush1.msra.mxu1 %v498_v48 }
  0x63   :  { %907 = vmatpush1.msra.mxu0 %v366_v47  ;;  %v359_v53 = vld [vmem:[#allocation7 + $0x48] sm:$0xff]  ;;  %977 = vmatprep.subr.mxu1 %v495_v50  ;;  %v358_v55 = vld [vmem:[#allocation7 + $0x40] sm:$0xff] }
  0x64   :  { %v491_v54 = vld [vmem:[#allocation7 + $0x468] sm:$0xff]  ;;  %908 = vmatprep.subr.mxu0 %v363_v49  ;;  %v490_v56 = vld [vmem:[#allocation7 + $0x460] sm:$0xff]  ;;  %978 = vmatpush1.msra.mxu1 %v494_v52 }
  0x65   :  { %909 = vmatpush1.msra.mxu0 %v362_v51  ;;  %v355_v57 = vld [vmem:[#allocation7 + $0x28] sm:$0xff]  ;;  %979 = vmatprep.subr.mxu1 %v491_v54  ;;  %v354_v59 = vld [vmem:[#allocation7 + $0x20] sm:$0xff] }
  0x66   :  { %v487_v58 = vld [vmem:[#allocation7 + $0x448] sm:$0xff]  ;;  %910 = vmatprep.subr.mxu0 %v359_v53  ;;  %v486_v60 = vld [vmem:[#allocation7 + $0x440] sm:$0xff]  ;;  %980 = vmatpush1.msra.mxu1 %v490_v56 }
  0x67   :  { %911 = vmatpush1.msra.mxu0 %v358_v55  ;;  %v351_v61 = vld [vmem:[#allocation7 + $0x8] sm:$0xff]  ;;  %981 = vmatprep.subr.mxu1 %v487_v58  ;;  %v350_v63 = vld [vmem:[#allocation7] sm:$0xff] }
  0x68   :  { %v483_v62 = vld [vmem:[#allocation7 + $0x428] sm:$0xff]  ;;  %912 = vmatprep.subr.mxu0 %v355_v57  ;;  %v482_v0 = vld [vmem:[#allocation7 + $0x420] sm:$0xff]  ;;  %982 = vmatpush1.msra.mxu1 %v486_v60 }
  0x69   :  { %913 = vmatpush1.msra.mxu0 %v354_v59  ;;  %v475_v1 = vld [vmem:[#allocation7 + $0x3e8] sm:$0xff]  ;;  %983 = vmatprep.subr.mxu1 %v483_v62  ;;  %v474_v3 = vld [vmem:[#allocation7 + $0x3e0] sm:$0xff] }
  0x6a   :  { %v479_v2 = vld [vmem:[#allocation7 + $0x408] sm:$0xff]  ;;  %914 = vmatprep.subr.mxu0 %v351_v61  ;;  %v478_v4 = vld [vmem:[#allocation7 + $0x400] sm:$0xff]  ;;  %984 = vmatpush1.msra.mxu1 %v482_v0 }
  0x6b   :  { %915 = vmatpush1.msra.mxu0 %v350_v63  ;;  %v471_v5 = vld [vmem:[#allocation7 + $0x3c8] sm:$0xff]  ;;  %985 = vmatprep.subr.mxu1 %v479_v2  ;;  %v470_v7 = vld [vmem:[#allocation7 + $0x3c0] sm:$0xff] }
  0x6c   :  { %v603_v6 = vld [vmem:[#allocation7 + $0x7e8] sm:$0xff]  ;;  %916 = vmatprep.subr.mxu0 %v475_v1  ;;  %v602_v8 = vld [vmem:[#allocation7 + $0x7e0] sm:$0xff]  ;;  %986 = vmatpush1.msra.mxu1 %v478_v4 }
  0x6d   :  { %917 = vmatpush2.msra.mxu0 %v474_v3  ;;  %v467_v9 = vld [vmem:[#allocation7 + $0x3a8] sm:$0xff]  ;;  %987 = vmatprep.subr.mxu1 %v603_v6  ;;  %v466_v11 = vld [vmem:[#allocation7 + $0x3a0] sm:$0xff]  ;;  %v108_v6 = vld [vmem:[#allocation2 + $0x8] sm:$0xff] }
  0x6e   :  { %v599_v10 = vld [vmem:[#allocation7 + $0x7c8] sm:$0xff]  ;;  %918 = vmatprep.subr.mxu0 %v471_v5  ;;  %v598_v12 = vld [vmem:[#allocation7 + $0x7c0] sm:$0xff]  ;;  %988 = vmatpush2.msra.mxu1 %v602_v8  ;;  %v310_v8 = vmax.f32 %v108_v6, 0.0 }
  0x6f   :  { %919 = vmatpush2.msra.mxu0 %v470_v7  ;;  %v463_v13 = vld [vmem:[#allocation7 + $0x388] sm:$0xff]  ;;  %989 = vmatprep.subr.mxu1 %v599_v10  ;;  %v462_v15 = vld [vmem:[#allocation7 + $0x380] sm:$0xff] }
  0x70   :  { %v595_v14 = vld [vmem:[#allocation7 + $0x7a8] sm:$0xff]  ;;  %920 = vmatprep.subr.mxu0 %v467_v9  ;;  %v594_v16 = vld [vmem:[#allocation7 + $0x7a0] sm:$0xff]  ;;  %990 = vmatpush2.msra.mxu1 %v598_v12 }
  0x71   :  { %921 = vmatpush2.msra.mxu0 %v466_v11  ;;  %v459_v17 = vld [vmem:[#allocation7 + $0x368] sm:$0xff]  ;;  %991 = vmatprep.subr.mxu1 %v595_v14  ;;  %v458_v19 = vld [vmem:[#allocation7 + $0x360] sm:$0xff] }
  0x72   :  { %v591_v18 = vld [vmem:[#allocation7 + $0x788] sm:$0xff]  ;;  %922 = vmatprep.subr.mxu0 %v463_v13  ;;  %v590_v20 = vld [vmem:[#allocation7 + $0x780] sm:$0xff]  ;;  %992 = vmatpush2.msra.mxu1 %v594_v16 }
  0x73   :  { %923 = vmatpush2.msra.mxu0 %v462_v15  ;;  %v455_v21 = vld [vmem:[#allocation7 + $0x348] sm:$0xff]  ;;  %993 = vmatprep.subr.mxu1 %v591_v18  ;;  %v454_v23 = vld [vmem:[#allocation7 + $0x340] sm:$0xff] }
  0x74   :  { %v587_v22 = vld [vmem:[#allocation7 + $0x768] sm:$0xff]  ;;  %924 = vmatprep.subr.mxu0 %v459_v17  ;;  %v586_v24 = vld [vmem:[#allocation7 + $0x760] sm:$0xff]  ;;  %994 = vmatpush2.msra.mxu1 %v590_v20 }
  0x75   :  { %925 = vmatpush2.msra.mxu0 %v458_v19  ;;  %v451_v25 = vld [vmem:[#allocation7 + $0x328] sm:$0xff]  ;;  %995 = vmatprep.subr.mxu1 %v587_v22  ;;  %v450_v27 = vld [vmem:[#allocation7 + $0x320] sm:$0xff] }
  0x76   :  { %v583_v26 = vld [vmem:[#allocation7 + $0x748] sm:$0xff]  ;;  %926 = vmatprep.subr.mxu0 %v455_v21  ;;  %v582_v28 = vld [vmem:[#allocation7 + $0x740] sm:$0xff]  ;;  %996 = vmatpush2.msra.mxu1 %v586_v24 }
  0x77   :  { %927 = vmatpush2.msra.mxu0 %v454_v23  ;;  %v447_v29 = vld [vmem:[#allocation7 + $0x308] sm:$0xff]  ;;  %997 = vmatprep.subr.mxu1 %v583_v26  ;;  %v446_v31 = vld [vmem:[#allocation7 + $0x300] sm:$0xff] }
  0x78   :  { %v579_v30 = vld [vmem:[#allocation7 + $0x728] sm:$0xff]  ;;  %928 = vmatprep.subr.mxu0 %v451_v25  ;;  %v578_v32 = vld [vmem:[#allocation7 + $0x720] sm:$0xff]  ;;  %998 = vmatpush2.msra.mxu1 %v582_v28 }
  0x79   :  { %929 = vmatpush2.msra.mxu0 %v450_v27  ;;  %v443_v33 = vld [vmem:[#allocation7 + $0x2e8] sm:$0xff]  ;;  %999 = vmatprep.subr.mxu1 %v579_v30  ;;  %v442_v35 = vld [vmem:[#allocation7 + $0x2e0] sm:$0xff] }
  0x7a   :  { %v575_v34 = vld [vmem:[#allocation7 + $0x708] sm:$0xff]  ;;  %930 = vmatprep.subr.mxu0 %v447_v29  ;;  %v574_v36 = vld [vmem:[#allocation7 + $0x700] sm:$0xff]  ;;  %1000 = vmatpush2.msra.mxu1 %v578_v32 }
  0x7b   :  { %931 = vmatpush2.msra.mxu0 %v446_v31  ;;  %v439_v37 = vld [vmem:[#allocation7 + $0x2c8] sm:$0xff]  ;;  %1001 = vmatprep.subr.mxu1 %v575_v34  ;;  %v438_v39 = vld [vmem:[#allocation7 + $0x2c0] sm:$0xff] }
  0x7c   :  { %v571_v38 = vld [vmem:[#allocation7 + $0x6e8] sm:$0xff]  ;;  %932 = vmatprep.subr.mxu0 %v443_v33  ;;  %v570_v40 = vld [vmem:[#allocation7 + $0x6e0] sm:$0xff]  ;;  %1002 = vmatpush2.msra.mxu1 %v574_v36 }
  0x7d   :  { %933 = vmatpush2.msra.mxu0 %v442_v35  ;;  %v435_v41 = vld [vmem:[#allocation7 + $0x2a8] sm:$0xff]  ;;  %1003 = vmatprep.subr.mxu1 %v571_v38  ;;  %v434_v43 = vld [vmem:[#allocation7 + $0x2a0] sm:$0xff] }
  0x7e   :  { %v567_v42 = vld [vmem:[#allocation7 + $0x6c8] sm:$0xff]  ;;  %934 = vmatprep.subr.mxu0 %v439_v37  ;;  %v566_v44 = vld [vmem:[#allocation7 + $0x6c0] sm:$0xff]  ;;  %1004 = vmatpush2.msra.mxu1 %v570_v40 }
  0x7f   :  { %935 = vmatpush2.msra.mxu0 %v438_v39  ;;  %v431_v45 = vld [vmem:[#allocation7 + $0x288] sm:$0xff]  ;;  %1005 = vmatprep.subr.mxu1 %v567_v42  ;;  %v430_v47 = vld [vmem:[#allocation7 + $0x280] sm:$0xff] }
  0x80   :  { %v563_v46 = vld [vmem:[#allocation7 + $0x6a8] sm:$0xff]  ;;  %936 = vmatprep.subr.mxu0 %v435_v41  ;;  %v562_v48 = vld [vmem:[#allocation7 + $0x6a0] sm:$0xff]  ;;  %1006 = vmatpush2.msra.mxu1 %v566_v44 }
  0x81   :  { %937 = vmatpush2.msra.mxu0 %v434_v43  ;;  %v427_v49 = vld [vmem:[#allocation7 + $0x268] sm:$0xff]  ;;  %1007 = vmatprep.subr.mxu1 %v563_v46  ;;  %v426_v51 = vld [vmem:[#allocation7 + $0x260] sm:$0xff] }
  0x82   :  { %v559_v50 = vld [vmem:[#allocation7 + $0x688] sm:$0xff]  ;;  %938 = vmatprep.subr.mxu0 %v431_v45  ;;  %v558_v52 = vld [vmem:[#allocation7 + $0x680] sm:$0xff]  ;;  %1008 = vmatpush2.msra.mxu1 %v562_v48 }
  0x83   :  { %939 = vmatpush2.msra.mxu0 %v430_v47  ;;  %v423_v53 = vld [vmem:[#allocation7 + $0x248] sm:$0xff]  ;;  %1009 = vmatprep.subr.mxu1 %v559_v50  ;;  %v422_v55 = vld [vmem:[#allocation7 + $0x240] sm:$0xff] }
  0x84   :  { %v555_v54 = vld [vmem:[#allocation7 + $0x668] sm:$0xff]  ;;  %940 = vmatprep.subr.mxu0 %v427_v49  ;;  %v554_v56 = vld [vmem:[#allocation7 + $0x660] sm:$0xff]  ;;  %1010 = vmatpush2.msra.mxu1 %v558_v52 }
  0x85   :  { %941 = vmatpush2.msra.mxu0 %v426_v51  ;;  %v419_v57 = vld [vmem:[#allocation7 + $0x228] sm:$0xff]  ;;  %1011 = vmatprep.subr.mxu1 %v555_v54  ;;  %v418_v59 = vld [vmem:[#allocation7 + $0x220] sm:$0xff] }
  0x86   :  { %v551_v58 = vld [vmem:[#allocation7 + $0x648] sm:$0xff]  ;;  %942 = vmatprep.subr.mxu0 %v423_v53  ;;  %v550_v60 = vld [vmem:[#allocation7 + $0x640] sm:$0xff]  ;;  %1012 = vmatpush2.msra.mxu1 %v554_v56 }
  0x87   :  { %943 = vmatpush2.msra.mxu0 %v422_v55  ;;  %v415_v61 = vld [vmem:[#allocation7 + $0x208] sm:$0xff]  ;;  %1013 = vmatprep.subr.mxu1 %v551_v58  ;;  %v414_v63 = vld [vmem:[#allocation7 + $0x200] sm:$0xff] }
  0x88   :  { %v547_v62 = vld [vmem:[#allocation7 + $0x628] sm:$0xff]  ;;  %944 = vmatprep.subr.mxu0 %v419_v57  ;;  %v546_v0 = vld [vmem:[#allocation7 + $0x620] sm:$0xff]  ;;  %1014 = vmatpush2.msra.mxu1 %v550_v60 }
  0x89   :  { %945 = vmatpush2.msra.mxu0 %v418_v59  ;;  %v543_v1 = vld [vmem:[#allocation7 + $0x608] sm:$0xff]  ;;  %1015 = vmatprep.subr.mxu1 %v547_v62  ;;  %v542_v3 = vld [vmem:[#allocation7 + $0x600] sm:$0xff] }
  0x8a   :  { %v667_v2 = vld [vmem:[#allocation7 + $0x9e8] sm:$0xff]  ;;  %946 = vmatprep.subr.mxu0 %v415_v61  ;;  %1016 = vmatpush2.msra.mxu1 %v546_v0  ;;  %v666_v26 = vld [vmem:[#allocation7 + $0x9e0] sm:$0xff] }
  0x8b   :  { %947 = vmatpush2.msra.mxu0 %v414_v63  ;;  %v795_v4 = vld [vmem:[#allocation7 + $0xde8] sm:$0xff]  ;;  %1017 = vmatprep.subr.mxu1 %v543_v1  ;;  %v662_v35 = vld [vmem:[#allocation7 + $0x9c0] sm:$0xff] }
  0x8c   :  { %1026 = vmatprep.subr.mxu0 %v667_v2  ;;  %1018 = vmatpush2.msra.mxu1 %v542_v3  ;;  %v107_v5 = vld [vmem:[#allocation2] sm:$0xff]  ;;  %v794_v36 = vld [vmem:[#allocation7 + $0xde0] sm:$0xff] }
  0x8d   :  { %1097 = vmatprep.subr.mxu1 %v795_v4  ;;  %v309_v7 = vmax.f32 %v107_v5, 0.0  ;;  %v663_v29 = vld [vmem:[#allocation7 + $0x9c8] sm:$0xff]  ;;  %v658_v41 = vld [vmem:[#allocation7 + $0x9a0] sm:$0xff] }
  0x8e   :  { %v659_v39 = vld [vmem:[#allocation7 + $0x9a8] sm:$0xff]  ;;  %v790_v42 = vld [vmem:[#allocation7 + $0xdc0] sm:$0xff] }
  0x8f   :  { %v791_v40 = vld [vmem:[#allocation7 + $0xdc8] sm:$0xff]  ;;  %v654_v46 = vld [vmem:[#allocation7 + $0x980] sm:$0xff] }
  0x90   :  { %v655_v43 = vld [vmem:[#allocation7 + $0x988] sm:$0xff]  ;;  %v786_v47 = vld [vmem:[#allocation7 + $0xda0] sm:$0xff] }
  0x91   :  { %v787_v45 = vld [vmem:[#allocation7 + $0xda8] sm:$0xff]  ;;  %v650_v50 = vld [vmem:[#allocation7 + $0x960] sm:$0xff] }
  0x92   :  { %v651_v48 = vld [vmem:[#allocation7 + $0x968] sm:$0xff]  ;;  %v782_v51 = vld [vmem:[#allocation7 + $0xd80] sm:$0xff] }
  0x93   :  { %v783_v49 = vld [vmem:[#allocation7 + $0xd88] sm:$0xff]  ;;  %v646_v54 = vld [vmem:[#allocation7 + $0x940] sm:$0xff] }
  0x94   :  { %v647_v52 = vld [vmem:[#allocation7 + $0x948] sm:$0xff]  ;;  %v778_v55 = vld [vmem:[#allocation7 + $0xd60] sm:$0xff] }
  0x95   :  { %v779_v53 = vld [vmem:[#allocation7 + $0xd68] sm:$0xff]  ;;  %v642_v58 = vld [vmem:[#allocation7 + $0x920] sm:$0xff] }
  0x96   :  { %v643_v56 = vld [vmem:[#allocation7 + $0x928] sm:$0xff]  ;;  %v774_v59 = vld [vmem:[#allocation7 + $0xd40] sm:$0xff] }
  0x97   :  { %v775_v57 = vld [vmem:[#allocation7 + $0xd48] sm:$0xff]  ;;  %v638_v62 = vld [vmem:[#allocation7 + $0x900] sm:$0xff] }
  0x98   :  { %v639_v60 = vld [vmem:[#allocation7 + $0x908] sm:$0xff]  ;;  %v770_v63 = vld [vmem:[#allocation7 + $0xd20] sm:$0xff] }
  0x99   :  { %v771_v61 = vld [vmem:[#allocation7 + $0xd28] sm:$0xff]  ;;  %v634_v2 = vld [vmem:[#allocation7 + $0x8e0] sm:$0xff] }
  0x9a   :  { %v635_v0 = vld [vmem:[#allocation7 + $0x8e8] sm:$0xff]  ;;  %v766_v3 = vld [vmem:[#allocation7 + $0xd00] sm:$0xff] }
  0x9b   :  { %v767_v1 = vld [vmem:[#allocation7 + $0xd08] sm:$0xff] }
  0x9c   :  { %v631_v4 = vld [vmem:[#allocation7 + $0x8c8] sm:$0xff] }
  0xc6   :  { %v119_v9 = vpop.permute.xlu0 %118 }
  0xc7   :  { %v121_v10 = vmul.f32 %v119_v9, %v107_v5  ;;  %v311_v11 = vmul.f32 %v309_v7, %v119_v9  ;;  %v312_v12 = vmul.f32 %v310_v8, %v119_v9  ;;  %v122_v20 = vmul.f32 %v119_v9, %v108_v6  ;;  %v763_v5 = vld [vmem:[#allocation7 + $0xce8] sm:$0xff]  ;;  %v630_v6 = vld [vmem:[#allocation7 + $0x8c0] sm:$0xff] }
  0xc8   :  { %v762_v7 = vld [vmem:[#allocation7 + $0xce0] sm:$0xff]  ;;  %v627_v8 = vld [vmem:[#allocation7 + $0x8a8] sm:$0xff] }
  0xc9   :  { %v759_v9 = vld [vmem:[#allocation7 + $0xcc8] sm:$0xff] }
  0xca   :  { %v126_v13 = vpop.permute.xlu0 %125 }
  0xcb   :  { %v128_v14 = vadd.f32 %v126_v13, %v121_v10  ;;  %v2353_v15 = vadd.f32 %v311_v11, %v126_v13  ;;  %v314_v16 = vadd.f32 %v312_v12, %v126_v13  ;;  %v129_v27 = vadd.f32 %v126_v13, %v122_v20  ;;  %v626_v10 = vld [vmem:[#allocation7 + $0x8a0] sm:$0xff]  ;;  %v623_v12 = vld [vmem:[#allocation7 + $0x888] sm:$0xff] }
  0xcc   :  { %v758_v11 = vld [vmem:[#allocation7 + $0xcc0] sm:$0xff]  ;;  %v755_v13 = vld [vmem:[#allocation7 + $0xca8] sm:$0xff] }
  0xcd   :  { %v2355_v17 = vmax.f32 %v128_v14, 0.0  ;;  %v326_v18 = vrot.slane %v314_v16, 3  ;;  %v2358_v19 = vrot.slane %v2353_v15, 3  ;;  %v318_v21 = vrot.slane %v314_v16, 1  ;;  %v622_v14 = vld [vmem:[#allocation7 + $0x880] sm:$0xff]  ;;  %v751_v20 = vld [vmem:[#allocation7 + $0xc88] sm:$0xff] }
  0xce   :  { %v322_v22 = vrot.slane %v314_v16, 2  ;;  %v317_v23 = vrot.slane %v2353_v15, 1  ;;  %v2385_v38 = vmax.f32 %v129_v27, 0.0  ;;  %v614_v27 = vld [vmem:[#allocation7 + $0x840] sm:$0xff] }
  0xcf   :  { %243 = vrot.lane.b32.xlu0 %v2355_v17, %s2269_s8  ;;  %287 = vrot.lane.b32.xlu1 %v2355_v17, %s2270_s21  ;;  %v2366_v24 = vsel %vm341_vm0, %v314_v16, %v326_v18  ;;  %v2371_v25 = vsel %vm341_vm0, %v2353_v15, %v2358_v19  ;;  %v330_v28 = vrot.slane %v318_v21, 3  ;;  %v334_v37 = vrot.slane %v326_v18, 3  ;;  %v754_v16 = vld [vmem:[#allocation7 + $0xca0] sm:$0xff] }
  0xd0   :  { %948 = vmatprep.mubr.f32.mxu0 %v2366_v24  ;;  %v332_v30 = vrot.slane %v322_v22, 3  ;;  %v329_v31 = vrot.slane %v317_v23, 3 }
  0xd1   :  { %949 = vmatmul.mubr.f32.vlgmr.msra.gmra.mxu0 %v2371_v25  ;;  %v2376_v32 = vsel %vm341_vm0, %v318_v21, %v330_v28  ;;  %v2394_v44 = vsel %vm341_vm0, %v326_v18, %v334_v37  ;;  %v619_v18 = vld [vmem:[#allocation7 + $0x868] sm:$0xff]  ;;  %v618_v21 = vld [vmem:[#allocation7 + $0x860] sm:$0xff] }
  0xd2   :  { %1027 = vmatpush1.msra.mxu0 %v666_v26  ;;  %v2379_v33 = vsel %vm341_vm0, %v322_v22, %v332_v30  ;;  %v2382_v34 = vsel %vm341_vm0, %v317_v23, %v329_v31  ;;  %1019 = vmatprep.mubr.f32.mxu1 %v2376_v32  ;;  %v750_v22 = vld [vmem:[#allocation7 + $0xc80] sm:$0xff]  ;;  %v615_v23 = vld [vmem:[#allocation7 + $0x848] sm:$0xff] }
  0xd3   :  { %1028 = vmatprep.subr.mxu0 %v663_v29  ;;  %1090 = vmatprep.mubr.f32.mxu0 %v2379_v33  ;;  %v747_v26 = vld [vmem:[#allocation7 + $0xc68] sm:$0xff]  ;;  %v746_v28 = vld [vmem:[#allocation7 + $0xc60] sm:$0xff] }
  0xd4   :  { %1020 = vmatmul.mubr.f32.vlgmr.msra.gmra.mxu1 %v2382_v34  ;;  %1029 = vmatpush1.msra.mxu0 %v662_v35  ;;  %v1486_v29 = vld [vmem:[%s2810_s3] sm:$0x3]  ;;  %v610_v35 = vld [vmem:[#allocation7 + $0x820] sm:$0xff] }
  0xd5   :  { %1098 = vmatpush1.msra.mxu1 %v794_v36  ;;  %265 = vrot.lane.b32.xlu0 %v2355_v17, %s2271_s22  ;;  %v611_v30 = vld [vmem:[#allocation7 + $0x828] sm:$0xff]  ;;  %v742_v36 = vld [vmem:[#allocation7 + $0xc40] sm:$0xff] }
  0xd6   :  { %289 = vrot.lane.b32.xlu1 %v2385_v38, %s2270_s21  ;;  %1030 = vmatprep.subr.mxu0 %v659_v39  ;;  %v743_v31 = vld [vmem:[#allocation7 + $0xc48] sm:$0xff] }
  0xd7   :  { %1099 = vmatprep.subr.mxu1 %v791_v40  ;;  %1161 = vmatprep.mubr.f32.mxu1 %v2394_v44  ;;  %v607_v37 = vld [vmem:[#allocation7 + $0x808] sm:$0xff]  ;;  %v606_v40 = vld [vmem:[#allocation7 + $0x800] sm:$0xff] }
  0xd8   :  { %1031 = vmatpush1.msra.mxu0 %v658_v41  ;;  %1100 = vmatpush1.msra.mxu1 %v790_v42  ;;  %v739_v39 = vld [vmem:[#allocation7 + $0xc28] sm:$0xff]  ;;  %v738_v41 = vld [vmem:[#allocation7 + $0xc20] sm:$0xff] }
  0xd9   :  { %1032 = vmatprep.subr.mxu0 %v655_v43  ;;  %1101 = vmatprep.subr.mxu1 %v787_v45  ;;  %v2071_v42 = vld [vmem:[%s2808_s1 + $0x18] sm:$0xff] }
  0xda   :  { %1033 = vmatpush1.msra.mxu0 %v654_v46  ;;  %1102 = vmatpush1.msra.mxu1 %v786_v47  ;;  %v731_v43 = vld [vmem:[#allocation7 + $0xbe8] sm:$0xff]  ;;  %v730_v46 = vld [vmem:[#allocation7 + $0xbe0] sm:$0xff] }
  0xdb   :  { %177 = vrot.lane.b32.xlu0 %v2355_v17, %s2272_s23  ;;  %245 = vrot.lane.b32.xlu1 %v2385_v38, %s2269_s8  ;;  %v735_v45 = vld [vmem:[#allocation7 + $0xc08] sm:$0xff]  ;;  %v734_v47 = vld [vmem:[#allocation7 + $0xc00] sm:$0xff] }
  0xdc   :  { %1034 = vmatprep.subr.mxu0 %v651_v48  ;;  %1103 = vmatprep.subr.mxu1 %v783_v49  ;;  %v727_v48 = vld [vmem:[#allocation7 + $0xbc8] sm:$0xff] }
  0xdd   :  { %1035 = vmatpush1.msra.mxu0 %v650_v50  ;;  %1104 = vmatpush1.msra.mxu1 %v782_v51  ;;  %v859_v49 = vld [vmem:[#allocation7 + $0xfe8] sm:$0xff]  ;;  %v726_v50 = vld [vmem:[#allocation7 + $0xbc0] sm:$0xff] }
  0xde   :  { %1036 = vmatprep.subr.mxu0 %v647_v52  ;;  %1105 = vmatprep.subr.mxu1 %v779_v53  ;;  %v858_v51 = vld [vmem:[#allocation7 + $0xfe0] sm:$0xff]  ;;  %v723_v52 = vld [vmem:[#allocation7 + $0xba8] sm:$0xff] }
  0xdf   :  { %1037 = vmatpush1.msra.mxu0 %v646_v54  ;;  %1106 = vmatpush1.msra.mxu1 %v778_v55  ;;  %v855_v53 = vld [vmem:[#allocation7 + $0xfc8] sm:$0xff]  ;;  %v722_v54 = vld [vmem:[#allocation7 + $0xba0] sm:$0xff] }
  0xe0   :  { %221 = vrot.lane.b32.xlu0 %v2355_v17, %s2273_s2  ;;  %267 = vrot.lane.b32.xlu1 %v2385_v38, %s2271_s22  ;;  %v854_v55 = vld [vmem:[#allocation7 + $0xfc0] sm:$0xff] }
  0xe1   :  { %1038 = vmatprep.subr.mxu0 %v643_v56  ;;  %1107 = vmatprep.subr.mxu1 %v775_v57  ;;  %v719_v56 = vld [vmem:[#allocation7 + $0xb88] sm:$0xff] }
  0xe2   :  { %1039 = vmatpush1.msra.mxu0 %v642_v58  ;;  %1108 = vmatpush1.msra.mxu1 %v774_v59  ;;  %v851_v57 = vld [vmem:[#allocation7 + $0xfa8] sm:$0xff]  ;;  %v718_v58 = vld [vmem:[#allocation7 + $0xb80] sm:$0xff] }
  0xe3   :  { %1040 = vmatprep.subr.mxu0 %v639_v60  ;;  %1109 = vmatprep.subr.mxu1 %v771_v61  ;;  %v850_v59 = vld [vmem:[#allocation7 + $0xfa0] sm:$0xff]  ;;  %v715_v60 = vld [vmem:[#allocation7 + $0xb68] sm:$0xff] }
  0xe4   :  { %1041 = vmatpush1.msra.mxu0 %v638_v62  ;;  %1110 = vmatpush1.msra.mxu1 %v770_v63  ;;  %v847_v61 = vld [vmem:[#allocation7 + $0xf88] sm:$0xff]  ;;  %v714_v62 = vld [vmem:[#allocation7 + $0xb60] sm:$0xff] }
  0xe5   :  { %132 = vrot.lane.b32.xlu0 %v2355_v17, %s2274_s24  ;;  %179 = vrot.lane.b32.xlu1 %v2385_v38, %s2272_s23  ;;  %v846_v63 = vld [vmem:[#allocation7 + $0xf80] sm:$0xff] }
  0xe6   :  { %1042 = vmatprep.subr.mxu0 %v635_v0  ;;  %1111 = vmatprep.subr.mxu1 %v767_v1  ;;  %v711_v0 = vld [vmem:[#allocation7 + $0xb48] sm:$0xff] }
  0xe7   :  { %1043 = vmatpush1.msra.mxu0 %v634_v2  ;;  %1112 = vmatpush1.msra.mxu1 %v766_v3  ;;  %v843_v1 = vld [vmem:[#allocation7 + $0xf68] sm:$0xff]  ;;  %v710_v2 = vld [vmem:[#allocation7 + $0xb40] sm:$0xff] }
  0xe8   :  { %1044 = vmatprep.subr.mxu0 %v631_v4  ;;  %1113 = vmatprep.subr.mxu1 %v763_v5  ;;  %v842_v3 = vld [vmem:[#allocation7 + $0xf60] sm:$0xff]  ;;  %v707_v4 = vld [vmem:[#allocation7 + $0xb28] sm:$0xff] }
  0xe9   :  { %1045 = vmatpush1.msra.mxu0 %v630_v6  ;;  %1114 = vmatpush1.msra.mxu1 %v762_v7  ;;  %v839_v5 = vld [vmem:[#allocation7 + $0xf48] sm:$0xff]  ;;  %v706_v6 = vld [vmem:[#allocation7 + $0xb20] sm:$0xff] }
  0xea   :  { %199 = vrot.lane.b32.xlu0 %v2355_v17, %s2275_s25  ;;  %223 = vrot.lane.b32.xlu1 %v2385_v38, %s2273_s2  ;;  %v838_v7 = vld [vmem:[#allocation7 + $0xf40] sm:$0xff] }
  0xeb   :  { %1046 = vmatprep.subr.mxu0 %v627_v8  ;;  %1115 = vmatprep.subr.mxu1 %v759_v9  ;;  %v703_v8 = vld [vmem:[#allocation7 + $0xb08] sm:$0xff] }
  0xec   :  { %1047 = vmatpush1.msra.mxu0 %v626_v10  ;;  %1116 = vmatpush1.msra.mxu1 %v758_v11  ;;  %v835_v9 = vld [vmem:[#allocation7 + $0xf28] sm:$0xff]  ;;  %v702_v10 = vld [vmem:[#allocation7 + $0xb00] sm:$0xff] }
  0xed   :  { %1048 = vmatprep.subr.mxu0 %v623_v12  ;;  %1117 = vmatprep.subr.mxu1 %v755_v13  ;;  %v834_v11 = vld [vmem:[#allocation7 + $0xf20] sm:$0xff]  ;;  %v699_v12 = vld [vmem:[#allocation7 + $0xae8] sm:$0xff] }
  0xee   :  { %1049 = vmatpush1.msra.mxu0 %v622_v14  ;;  %1118 = vmatpush1.msra.mxu1 %v754_v16  ;;  %v831_v13 = vld [vmem:[#allocation7 + $0xf08] sm:$0xff]  ;;  %v698_v14 = vld [vmem:[#allocation7 + $0xae0] sm:$0xff] }
  0xef   :  { %155 = vrot.lane.b32.xlu0 %v2355_v17, %s2267_s15  ;;  %134 = vrot.lane.b32.xlu1 %v2385_v38, %s2274_s24  ;;  %v830_v16 = vld [vmem:[#allocation7 + $0xf00] sm:$0xff] }
  0xf0   :  { %1050 = vmatprep.subr.mxu0 %v619_v18  ;;  %1119 = vmatprep.subr.mxu1 %v751_v20  ;;  %v695_v18 = vld [vmem:[#allocation7 + $0xac8] sm:$0xff] }
  0xf1   :  { %1051 = vmatpush1.msra.mxu0 %v618_v21  ;;  %1120 = vmatpush1.msra.mxu1 %v750_v22  ;;  %v827_v20 = vld [vmem:[#allocation7 + $0xee8] sm:$0xff]  ;;  %v694_v21 = vld [vmem:[#allocation7 + $0xac0] sm:$0xff] }
  0xf2   :  { %1052 = vmatprep.subr.mxu0 %v615_v23  ;;  %1121 = vmatprep.subr.mxu1 %v747_v26  ;;  %v826_v22 = vld [vmem:[#allocation7 + $0xee0] sm:$0xff]  ;;  %v691_v23 = vld [vmem:[#allocation7 + $0xaa8] sm:$0xff] }
  0xf3   :  { %1053 = vmatpush1.msra.mxu0 %v614_v27  ;;  %1122 = vmatpush1.msra.mxu1 %v746_v28  ;;  %v823_v26 = vld [vmem:[#allocation7 + $0xec8] sm:$0xff]  ;;  %v690_v27 = vld [vmem:[#allocation7 + $0xaa0] sm:$0xff] }
  0xf4   :  { %1489 = vperm.xlu0 %2104, %v1486_v29   ;;  %201 = vrot.lane.b32.xlu1 %v2385_v38, %s2275_s25  ;;  %v822_v28 = vld [vmem:[#allocation7 + $0xec0] sm:$0xff]  ;;  %v687_v29 = vld [vmem:[#allocation7 + $0xa88] sm:$0xff] }
  0xf5   :  { %1054 = vmatprep.subr.mxu0 %v611_v30  ;;  %1123 = vmatprep.subr.mxu1 %v743_v31  ;;  %v819_v30 = vld [vmem:[#allocation7 + $0xea8] sm:$0xff]  ;;  %v686_v31 = vld [vmem:[#allocation7 + $0xa80] sm:$0xff] }
  0xf6   :  { %1055 = vmatpush1.msra.mxu0 %v610_v35  ;;  %1124 = vmatpush1.msra.mxu1 %v742_v36  ;;  %v818_v35 = vld [vmem:[#allocation7 + $0xea0] sm:$0xff]  ;;  %v683_v36 = vld [vmem:[#allocation7 + $0xa68] sm:$0xff] }
  0xf7   :  { %1056 = vmatprep.subr.mxu0 %v607_v37  ;;  %1125 = vmatprep.subr.mxu1 %v739_v39  ;;  %v815_v37 = vld [vmem:[#allocation7 + $0xe88] sm:$0xff]  ;;  %v682_v39 = vld [vmem:[#allocation7 + $0xa60] sm:$0xff] }
  0xf8   :  { %1057 = vmatpush1.msra.mxu0 %v606_v40  ;;  %1126 = vmatpush1.msra.mxu1 %v738_v41  ;;  %v814_v40 = vld [vmem:[#allocation7 + $0xe80] sm:$0xff]  ;;  %v679_v41 = vld [vmem:[#allocation7 + $0xa48] sm:$0xff] }
  0xf9   :  { %1732 = vperm.xlu0 %2104, %v2071_v42   ;;  %157 = vrot.lane.b32.xlu1 %v2385_v38, %s2267_s15  ;;  %v321_v42 = vrot.slane %v2353_v15, 2  ;;  %v803_v15 = vld [vmem:[#allocation7 + $0xe28] sm:$0xff] }
  0xfa   :  { %1058 = vmatprep.subr.mxu0 %v731_v43  ;;  %1127 = vmatprep.subr.mxu1 %v735_v45  ;;  %v811_v43 = vld [vmem:[#allocation7 + $0xe68] sm:$0xff]  ;;  %v678_v45 = vld [vmem:[#allocation7 + $0xa40] sm:$0xff] }
  0xfb   :  { %1059 = vmatpush2.msra.mxu0 %v730_v46  ;;  %1128 = vmatpush1.msra.mxu1 %v734_v47  ;;  %v810_v46 = vld [vmem:[#allocation7 + $0xe60] sm:$0xff]  ;;  %v675_v47 = vld [vmem:[#allocation7 + $0xa28] sm:$0xff] }
  0xfc   :  { %1060 = vmatprep.subr.mxu0 %v727_v48  ;;  %1129 = vmatprep.subr.mxu1 %v859_v49  ;;  %v807_v48 = vld [vmem:[#allocation7 + $0xe48] sm:$0xff]  ;;  %v674_v49 = vld [vmem:[#allocation7 + $0xa20] sm:$0xff] }
  0xfd   :  { %1061 = vmatpush2.msra.mxu0 %v726_v50  ;;  %1130 = vmatpush2.msra.mxu1 %v858_v51  ;;  %v806_v50 = vld [vmem:[#allocation7 + $0xe40] sm:$0xff]  ;;  %v671_v51 = vld [vmem:[#allocation7 + $0xa08] sm:$0xff] }
  0xfe   :  { %1062 = vmatprep.subr.mxu0 %v723_v52  ;;  %1131 = vmatprep.subr.mxu1 %v855_v53  ;;  %v331_v52 = vrot.slane %v321_v42, 3  ;;  %v670_v53 = vld [vmem:[#allocation7 + $0xa00] sm:$0xff] }
  0xff   :  { %1063 = vmatpush2.msra.mxu0 %v722_v54  ;;  %1132 = vmatpush2.msra.mxu1 %v854_v55  ;;  %v802_v54 = vld [vmem:[#allocation7 + $0xe20] sm:$0xff]  ;;  %v799_v55 = vld [vmem:[#allocation7 + $0xe08] sm:$0xff] }
 0x100   :  { %1064 = vmatprep.subr.mxu0 %v719_v56  ;;  %1133 = vmatprep.subr.mxu1 %v851_v57  ;;  %v413_v56 = vld [vmem:[#allocation7 + $0x1f8] sm:$0xff]  ;;  %v333_v57 = vrot.slane %v2358_v19, 3 }
 0x101   :  { %1065 = vmatpush2.msra.mxu0 %v718_v58  ;;  %1134 = vmatpush2.msra.mxu1 %v850_v59  ;;  %v2430_v58 = vsel %vm341_vm0, %v321_v42, %v331_v52  ;;  %v798_v59 = vld [vmem:[#allocation7 + $0xe00] sm:$0xff]  ;;  %v372_v42 = vld [vmem:[#allocation7 + $0xb0] sm:$0xff] }
 0x102   :  { %1066 = vmatprep.subr.mxu0 %v715_v60  ;;  %1135 = vmatprep.subr.mxu1 %v847_v61  ;;  %v412_v60 = vld [vmem:[#allocation7 + $0x1f0] sm:$0xff]  ;;  %v409_v61 = vld [vmem:[#allocation7 + $0x1d8] sm:$0xff] }
 0x103   :  { %1067 = vmatpush2.msra.mxu0 %v714_v62  ;;  %1136 = vmatpush2.msra.mxu1 %v846_v63  ;;  %v541_v62 = vld [vmem:[#allocation7 + $0x5f8] sm:$0xff]  ;;  %v2435_v63 = vsel %vm341_vm0, %v2358_v19, %v333_v57  ;;  %v496_v52 = vld [vmem:[#allocation7 + $0x490] sm:$0xff] }
 0x104   :  { %1068 = vmatprep.subr.mxu0 %v711_v0  ;;  %1137 = vmatprep.subr.mxu1 %v843_v1  ;;  %v408_v0 = vld [vmem:[#allocation7 + $0x1d0] sm:$0xff]  ;;  %v533_v19 = vld [vmem:[#allocation7 + $0x5b8] sm:$0xff] }
 0x105   :  { %1069 = vmatpush2.msra.mxu0 %v710_v2  ;;  %1138 = vmatpush2.msra.mxu1 %v842_v3  ;;  %v540_v1 = vld [vmem:[#allocation7 + $0x5f0] sm:$0xff]  ;;  %v405_v2 = vld [vmem:[#allocation7 + $0x1b8] sm:$0xff] }
 0x106   :  { %1070 = vmatprep.subr.mxu0 %v707_v4  ;;  %1139 = vmatprep.subr.mxu1 %v839_v5  ;;  %v537_v3 = vld [vmem:[#allocation7 + $0x5d8] sm:$0xff]  ;;  %v404_v4 = vld [vmem:[#allocation7 + $0x1b0] sm:$0xff] }
 0x107   :  { %1071 = vmatpush2.msra.mxu0 %v706_v6  ;;  %1140 = vmatpush2.msra.mxu1 %v838_v7  ;;  %v536_v5 = vld [vmem:[#allocation7 + $0x5d0] sm:$0xff]  ;;  %v401_v6 = vld [vmem:[#allocation7 + $0x198] sm:$0xff] }
 0x108   :  { %1072 = vmatprep.subr.mxu0 %v703_v8  ;;  %1141 = vmatprep.subr.mxu1 %v835_v9  ;;  %v400_v7 = vld [vmem:[#allocation7 + $0x190] sm:$0xff]  ;;  %v529_v9 = vld [vmem:[#allocation7 + $0x598] sm:$0xff] }
 0x109   :  { %1073 = vmatpush2.msra.mxu0 %v702_v10  ;;  %1142 = vmatpush2.msra.mxu1 %v834_v11  ;;  %v532_v8 = vld [vmem:[#allocation7 + $0x5b0] sm:$0xff]  ;;  %v489_v57 = vld [vmem:[#allocation7 + $0x458] sm:$0xff] }
 0x10a   :  { %1074 = vmatprep.subr.mxu0 %v699_v12  ;;  %1143 = vmatprep.subr.mxu1 %v831_v13  ;;  %v396_v10 = vld [vmem:[#allocation7 + $0x170] sm:$0xff]  ;;  %v393_v12 = vld [vmem:[#allocation7 + $0x158] sm:$0xff] }
 0x10b   :  { %1075 = vmatpush2.msra.mxu0 %v698_v14  ;;  %1144 = vmatpush2.msra.mxu1 %v830_v16  ;;  %v528_v11 = vld [vmem:[#allocation7 + $0x590] sm:$0xff]  ;;  %v525_v13 = vld [vmem:[#allocation7 + $0x578] sm:$0xff] }
 0x10c   :  { %1076 = vmatprep.subr.mxu0 %v695_v18  ;;  %1145 = vmatprep.subr.mxu1 %v827_v20  ;;  %v392_v14 = vld [vmem:[#allocation7 + $0x150] sm:$0xff]  ;;  %v389_v16 = vld [vmem:[#allocation7 + $0x138] sm:$0xff] }
 0x10d   :  { %1077 = vmatpush2.msra.mxu0 %v694_v21  ;;  %1146 = vmatpush2.msra.mxu1 %v826_v22  ;;  %v521_v18 = vld [vmem:[#allocation7 + $0x558] sm:$0xff]  ;;  %v388_v20 = vld [vmem:[#allocation7 + $0x130] sm:$0xff] }
 0x10e   :  { %1078 = vmatprep.subr.mxu0 %v691_v23  ;;  %1147 = vmatprep.subr.mxu1 %v823_v26  ;;  %v520_v21 = vld [vmem:[#allocation7 + $0x550] sm:$0xff]  ;;  %v385_v22 = vld [vmem:[#allocation7 + $0x118] sm:$0xff] }
 0x10f   :  { %1079 = vmatpush2.msra.mxu0 %v690_v27  ;;  %1148 = vmatpush2.msra.mxu1 %v822_v28  ;;  %v517_v23 = vld [vmem:[#allocation7 + $0x538] sm:$0xff]  ;;  %v384_v26 = vld [vmem:[#allocation7 + $0x110] sm:$0xff] }
 0x110   :  { %1080 = vmatprep.subr.mxu0 %v687_v29  ;;  %1149 = vmatprep.subr.mxu1 %v819_v30  ;;  %v516_v27 = vld [vmem:[#allocation7 + $0x530] sm:$0xff]  ;;  %v381_v28 = vld [vmem:[#allocation7 + $0xf8] sm:$0xff] }
 0x111   :  { %1081 = vmatpush2.msra.mxu0 %v686_v31  ;;  %1150 = vmatpush2.msra.mxu1 %v818_v35  ;;  %v513_v29 = vld [vmem:[#allocation7 + $0x518] sm:$0xff]  ;;  %v380_v30 = vld [vmem:[#allocation7 + $0xf0] sm:$0xff] }
 0x112   :  { %1082 = vmatprep.subr.mxu0 %v683_v36  ;;  %1151 = vmatprep.subr.mxu1 %v815_v37  ;;  %v512_v31 = vld [vmem:[#allocation7 + $0x510] sm:$0xff]  ;;  %v377_v35 = vld [vmem:[#allocation7 + $0xd8] sm:$0xff] }
 0x113   :  { %1083 = vmatpush2.msra.mxu0 %v682_v39  ;;  %1152 = vmatpush2.msra.mxu1 %v814_v40  ;;  %v509_v36 = vld [vmem:[#allocation7 + $0x4f8] sm:$0xff]  ;;  %v376_v37 = vld [vmem:[#allocation7 + $0xd0] sm:$0xff] }
 0x114   :  { %1084 = vmatprep.subr.mxu0 %v679_v41  ;;  %1153 = vmatprep.subr.mxu1 %v811_v43  ;;  %v508_v39 = vld [vmem:[#allocation7 + $0x4f0] sm:$0xff]  ;;  %v373_v40 = vld [vmem:[#allocation7 + $0xb8] sm:$0xff] }
 0x115   :  { %1085 = vmatpush2.msra.mxu0 %v678_v45  ;;  %1154 = vmatpush2.msra.mxu1 %v810_v46  ;;  %v505_v41 = vld [vmem:[#allocation7 + $0x4d8] sm:$0xff]  ;;  %v504_v43 = vld [vmem:[#allocation7 + $0x4d0] sm:$0xff] }
 0x116   :  { %1086 = vmatprep.subr.mxu0 %v675_v47  ;;  %1155 = vmatprep.subr.mxu1 %v807_v48  ;;  %v369_v45 = vld [vmem:[#allocation7 + $0x98] sm:$0xff]  ;;  %v368_v47 = vld [vmem:[#allocation7 + $0x90] sm:$0xff] }
 0x117   :  { %1087 = vmatpush2.msra.mxu0 %v674_v49  ;;  %1156 = vmatpush2.msra.mxu1 %v806_v50  ;;  %v501_v46 = vld [vmem:[#allocation7 + $0x4b8] sm:$0xff]  ;;  %v500_v48 = vld [vmem:[#allocation7 + $0x4b0] sm:$0xff] }
 0x118   :  { %1088 = vmatprep.subr.mxu0 %v671_v51  ;;  %1157 = vmatprep.subr.mxu1 %v803_v15  ;;  %v365_v49 = vld [vmem:[#allocation7 + $0x78] sm:$0xff]  ;;  %v364_v51 = vld [vmem:[#allocation7 + $0x70] sm:$0xff] }
 0x119   :  { %1089 = vmatpush2.msra.mxu0 %v670_v53  ;;  %1158 = vmatpush2.msra.mxu1 %v802_v54  ;;  %v497_v50 = vld [vmem:[#allocation7 + $0x498] sm:$0xff]  ;;  %v360_v54 = vld [vmem:[#allocation7 + $0x50] sm:$0xff] }
 0x11a   :  { %1091 = vmatmul.mubr.f32.vlgmr.msra.gmra.mxu0 %v2430_v58  ;;  %1159 = vmatprep.subr.mxu1 %v799_v55  ;;  %v361_v15 = vld [vmem:[#allocation7 + $0x58] sm:$0xff]  ;;  %v492_v55 = vld [vmem:[#allocation7 + $0x470] sm:$0xff] }
 0x11b   :  { %1168 = vmatprep.subr.mxu0 %v413_v56  ;;  %1160 = vmatpush2.msra.mxu1 %v798_v59  ;;  %v493_v53 = vld [vmem:[#allocation7 + $0x478] sm:$0xff]  ;;  %v356_v59 = vld [vmem:[#allocation7 + $0x30] sm:$0xff] }
 0x11c   :  { %1169 = vmatpush1.msra.mxu0 %v412_v60  ;;  %1232 = vmatprep.mubr.f32.mxu0 %v2366_v24  ;;  %v397_v24 = vld [vmem:[#allocation7 + $0x178] sm:$0xff]  ;;  %v488_v60 = vld [vmem:[#allocation7 + $0x450] sm:$0xff] }
 0x11d   :  { %1162 = vmatmul.mubr.f32.vlgmr.msra.gmra.mxu1 %v2435_v63  ;;  %1170 = vmatprep.subr.mxu0 %v409_v61  ;;  %v357_v56 = vld [vmem:[#allocation7 + $0x38] sm:$0xff] }
 0x11e   :  { %1239 = vmatprep.subr.mxu1 %v541_v62  ;;  %1171 = vmatpush1.msra.mxu0 %v408_v0  ;;  %v353_v61 = vld [vmem:[#allocation7 + $0x18] sm:$0xff]  ;;  %v352_v0 = vld [vmem:[#allocation7 + $0x10] sm:$0xff] }
 0x11f   :  { %1240 = vmatpush1.msra.mxu1 %v540_v1  ;;  %1303 = vmatprep.mubr.f32.mxu1 %v2376_v32  ;;  %v524_v32 = vld [vmem:[#allocation7 + $0x570] sm:$0xff]  ;;  %v485_v62 = vld [vmem:[#allocation7 + $0x438] sm:$0xff] }
 0x120   :  { %1172 = vmatprep.subr.mxu0 %v405_v2  ;;  %1241 = vmatprep.subr.mxu1 %v537_v3  ;;  %v484_v1 = vld [vmem:[#allocation7 + $0x430] sm:$0xff]  ;;  %v477_v2 = vld [vmem:[#allocation7 + $0x3f8] sm:$0xff] }
 0x121   :  { %1173 = vmatpush1.msra.mxu0 %v404_v4  ;;  %1242 = vmatpush1.msra.mxu1 %v536_v5  ;;  %v481_v3 = vld [vmem:[#allocation7 + $0x418] sm:$0xff]  ;;  %v476_v4 = vld [vmem:[#allocation7 + $0x3f0] sm:$0xff] }
 0x122   :  { %1174 = vmatprep.subr.mxu0 %v401_v6  ;;  %1243 = vmatprep.subr.mxu1 %v533_v19  ;;  %v480_v5 = vld [vmem:[#allocation7 + $0x410] sm:$0xff]  ;;  %v473_v6 = vld [vmem:[#allocation7 + $0x3d8] sm:$0xff] }
 0x123   :  { %1175 = vmatpush1.msra.mxu0 %v400_v7  ;;  %1244 = vmatpush1.msra.mxu1 %v532_v8  ;;  %v605_v19 = vld [vmem:[#allocation7 + $0x7f8] sm:$0xff]  ;;  %v472_v7 = vld [vmem:[#allocation7 + $0x3d0] sm:$0xff] }
 0x124   :  { %1176 = vmatprep.subr.mxu0 %v397_v24  ;;  %1245 = vmatprep.subr.mxu1 %v529_v9  ;;  %v604_v8 = vld [vmem:[#allocation7 + $0x7f0] sm:$0xff]  ;;  %v469_v24 = vld [vmem:[#allocation7 + $0x3b8] sm:$0xff] }
 0x125   :  { %1177 = vmatpush1.msra.mxu0 %v396_v10  ;;  %1246 = vmatpush1.msra.mxu1 %v528_v11  ;;  %v601_v9 = vld [vmem:[#allocation7 + $0x7d8] sm:$0xff]  ;;  %v468_v10 = vld [vmem:[#allocation7 + $0x3b0] sm:$0xff] }
 0x126   :  { %1178 = vmatprep.subr.mxu0 %v393_v12  ;;  %1247 = vmatprep.subr.mxu1 %v525_v13  ;;  %v600_v11 = vld [vmem:[#allocation7 + $0x7d0] sm:$0xff]  ;;  %v465_v12 = vld [vmem:[#allocation7 + $0x398] sm:$0xff] }
 0x127   :  { %1179 = vmatpush1.msra.mxu0 %v392_v14  ;;  %1248 = vmatpush1.msra.mxu1 %v524_v32  ;;  %v597_v13 = vld [vmem:[#allocation7 + $0x7b8] sm:$0xff]  ;;  %v464_v14 = vld [vmem:[#allocation7 + $0x390] sm:$0xff] }
 0x128   :  { %1180 = vmatprep.subr.mxu0 %v389_v16  ;;  %1249 = vmatprep.subr.mxu1 %v521_v18  ;;  %v596_v32 = vld [vmem:[#allocation7 + $0x7b0] sm:$0xff]  ;;  %v461_v16 = vld [vmem:[#allocation7 + $0x378] sm:$0xff] }
 0x129   :  { %1181 = vmatpush1.msra.mxu0 %v388_v20  ;;  %1250 = vmatpush1.msra.mxu1 %v520_v21  ;;  %v593_v18 = vld [vmem:[#allocation7 + $0x798] sm:$0xff]  ;;  %v460_v20 = vld [vmem:[#allocation7 + $0x370] sm:$0xff] }
 0x12a   :  { %1182 = vmatprep.subr.mxu0 %v385_v22  ;;  %1251 = vmatprep.subr.mxu1 %v517_v23  ;;  %v592_v21 = vld [vmem:[#allocation7 + $0x790] sm:$0xff]  ;;  %v457_v22 = vld [vmem:[#allocation7 + $0x358] sm:$0xff] }
 0x12b   :  { %1183 = vmatpush1.msra.mxu0 %v384_v26  ;;  %1252 = vmatpush1.msra.mxu1 %v516_v27  ;;  %v589_v23 = vld [vmem:[#allocation7 + $0x778] sm:$0xff]  ;;  %v456_v26 = vld [vmem:[#allocation7 + $0x350] sm:$0xff] }
 0x12c   :  { %1184 = vmatprep.subr.mxu0 %v381_v28  ;;  %1253 = vmatprep.subr.mxu1 %v513_v29  ;;  %v588_v27 = vld [vmem:[#allocation7 + $0x770] sm:$0xff]  ;;  %v453_v28 = vld [vmem:[#allocation7 + $0x338] sm:$0xff] }
 0x12d   :  { %1185 = vmatpush1.msra.mxu0 %v380_v30  ;;  %1254 = vmatpush1.msra.mxu1 %v512_v31  ;;  %v585_v29 = vld [vmem:[#allocation7 + $0x758] sm:$0xff]  ;;  %v452_v30 = vld [vmem:[#allocation7 + $0x330] sm:$0xff] }
 0x12e   :  { %1186 = vmatprep.subr.mxu0 %v377_v35  ;;  %1255 = vmatprep.subr.mxu1 %v509_v36  ;;  %v584_v31 = vld [vmem:[#allocation7 + $0x750] sm:$0xff]  ;;  %v449_v35 = vld [vmem:[#allocation7 + $0x318] sm:$0xff] }
 0x12f   :  { %1187 = vmatpush1.msra.mxu0 %v376_v37  ;;  %1256 = vmatpush1.msra.mxu1 %v508_v39  ;;  %v581_v36 = vld [vmem:[#allocation7 + $0x738] sm:$0xff]  ;;  %v448_v37 = vld [vmem:[#allocation7 + $0x310] sm:$0xff] }
 0x130   :  { %1188 = vmatprep.subr.mxu0 %v373_v40  ;;  %1257 = vmatprep.subr.mxu1 %v505_v41  ;;  %v580_v39 = vld [vmem:[#allocation7 + $0x730] sm:$0xff]  ;;  %v445_v40 = vld [vmem:[#allocation7 + $0x2f8] sm:$0xff] }
 0x131   :  { %1189 = vmatpush1.msra.mxu0 %v372_v42  ;;  %1258 = vmatpush1.msra.mxu1 %v504_v43  ;;  %v577_v41 = vld [vmem:[#allocation7 + $0x718] sm:$0xff]  ;;  %v444_v42 = vld [vmem:[#allocation7 + $0x2f0] sm:$0xff] }
 0x132   :  { %1190 = vmatprep.subr.mxu0 %v369_v45  ;;  %1259 = vmatprep.subr.mxu1 %v501_v46  ;;  %v576_v43 = vld [vmem:[#allocation7 + $0x710] sm:$0xff]  ;;  %v441_v45 = vld [vmem:[#allocation7 + $0x2d8] sm:$0xff] }
 0x133   :  { %1191 = vmatpush1.msra.mxu0 %v368_v47  ;;  %1260 = vmatpush1.msra.mxu1 %v500_v48  ;;  %v573_v46 = vld [vmem:[#allocation7 + $0x6f8] sm:$0xff]  ;;  %v440_v47 = vld [vmem:[#allocation7 + $0x2d0] sm:$0xff] }
 0x134   :  { %1192 = vmatprep.subr.mxu0 %v365_v49  ;;  %1261 = vmatprep.subr.mxu1 %v497_v50  ;;  %v572_v48 = vld [vmem:[#allocation7 + $0x6f0] sm:$0xff]  ;;  %v437_v49 = vld [vmem:[#allocation7 + $0x2b8] sm:$0xff] }
 0x135   :  { %1193 = vmatpush1.msra.mxu0 %v364_v51  ;;  %1262 = vmatpush1.msra.mxu1 %v496_v52  ;;  %v569_v50 = vld [vmem:[#allocation7 + $0x6d8] sm:$0xff]  ;;  %v436_v51 = vld [vmem:[#allocation7 + $0x2b0] sm:$0xff] }
 0x136   :  { %1194 = vmatprep.subr.mxu0 %v361_v15  ;;  %1263 = vmatprep.subr.mxu1 %v493_v53  ;;  %v568_v52 = vld [vmem:[#allocation7 + $0x6d0] sm:$0xff]  ;;  %v433_v15 = vld [vmem:[#allocation7 + $0x298] sm:$0xff] }
 0x137   :  { %1195 = vmatpush1.msra.mxu0 %v360_v54  ;;  %1264 = vmatpush1.msra.mxu1 %v492_v55  ;;  %v565_v53 = vld [vmem:[#allocation7 + $0x6b8] sm:$0xff]  ;;  %v432_v54 = vld [vmem:[#allocation7 + $0x290] sm:$0xff] }
 0x138   :  { %1196 = vmatprep.subr.mxu0 %v357_v56  ;;  %1265 = vmatprep.subr.mxu1 %v489_v57  ;;  %v564_v55 = vld [vmem:[#allocation7 + $0x6b0] sm:$0xff]  ;;  %v429_v56 = vld [vmem:[#allocation7 + $0x278] sm:$0xff] }
 0x139   :  { %1197 = vmatpush1.msra.mxu0 %v356_v59  ;;  %1266 = vmatpush1.msra.mxu1 %v488_v60  ;;  %v561_v57 = vld [vmem:[#allocation7 + $0x698] sm:$0xff]  ;;  %v428_v59 = vld [vmem:[#allocation7 + $0x270] sm:$0xff] }
 0x13a   :  { %1198 = vmatprep.subr.mxu0 %v353_v61  ;;  %1267 = vmatprep.subr.mxu1 %v485_v62  ;;  %v560_v60 = vld [vmem:[#allocation7 + $0x690] sm:$0xff]  ;;  %v425_v61 = vld [vmem:[#allocation7 + $0x258] sm:$0xff] }
 0x13b   :  { %1199 = vmatpush1.msra.mxu0 %v352_v0  ;;  %1268 = vmatpush1.msra.mxu1 %v484_v1  ;;  %v557_v62 = vld [vmem:[#allocation7 + $0x678] sm:$0xff]  ;;  %v424_v0 = vld [vmem:[#allocation7 + $0x250] sm:$0xff] }
 0x13c   :  { %1200 = vmatprep.subr.mxu0 %v477_v2  ;;  %1269 = vmatprep.subr.mxu1 %v481_v3  ;;  %v556_v1 = vld [vmem:[#allocation7 + $0x670] sm:$0xff]  ;;  %v421_v2 = vld [vmem:[#allocation7 + $0x238] sm:$0xff] }
 0x13d   :  { %1201 = vmatpush2.msra.mxu0 %v476_v4  ;;  %1270 = vmatpush1.msra.mxu1 %v480_v5  ;;  %v553_v3 = vld [vmem:[#allocation7 + $0x658] sm:$0xff]  ;;  %v420_v4 = vld [vmem:[#allocation7 + $0x230] sm:$0xff] }
 0x13e   :  { %1202 = vmatprep.subr.mxu0 %v473_v6  ;;  %1271 = vmatprep.subr.mxu1 %v605_v19  ;;  %v552_v5 = vld [vmem:[#allocation7 + $0x650] sm:$0xff]  ;;  %v417_v6 = vld [vmem:[#allocation7 + $0x218] sm:$0xff] }
 0x13f   :  { %1203 = vmatpush2.msra.mxu0 %v472_v7  ;;  %1272 = vmatpush2.msra.mxu1 %v604_v8  ;;  %v549_v19 = vld [vmem:[#allocation7 + $0x638] sm:$0xff]  ;;  %v416_v7 = vld [vmem:[#allocation7 + $0x210] sm:$0xff] }
 0x140   :  { %1204 = vmatprep.subr.mxu0 %v469_v24  ;;  %1273 = vmatprep.subr.mxu1 %v601_v9  ;;  %v548_v8 = vld [vmem:[#allocation7 + $0x630] sm:$0xff]  ;;  %v545_v24 = vld [vmem:[#allocation7 + $0x618] sm:$0xff] }
 0x141   :  { %1205 = vmatpush2.msra.mxu0 %v468_v10  ;;  %1274 = vmatpush2.msra.mxu1 %v600_v11  ;;  %v669_v9 = vld [vmem:[#allocation7 + $0x9f8] sm:$0xff]  ;;  %v544_v10 = vld [vmem:[#allocation7 + $0x610] sm:$0xff] }
 0x142   :  { %1206 = vmatprep.subr.mxu0 %v465_v12  ;;  %1275 = vmatprep.subr.mxu1 %v597_v13  ;;  %v668_v11 = vld [vmem:[#allocation7 + $0x9f0] sm:$0xff]  ;;  %v665_v12 = vld [vmem:[#allocation7 + $0x9d8] sm:$0xff] }
 0x143   :  { %1207 = vmatpush2.msra.mxu0 %v464_v14  ;;  %1276 = vmatpush2.msra.mxu1 %v596_v32  ;;  %v797_v13 = vld [vmem:[#allocation7 + $0xdf8] sm:$0xff]  ;;  %v664_v14 = vld [vmem:[#allocation7 + $0x9d0] sm:$0xff] }
 0x144   :  { %1208 = vmatprep.subr.mxu0 %v461_v16  ;;  %1277 = vmatprep.subr.mxu1 %v593_v18  ;;  %v796_v32 = vld [vmem:[#allocation7 + $0xdf0] sm:$0xff]  ;;  %v661_v16 = vld [vmem:[#allocation7 + $0x9b8] sm:$0xff] }
 0x145   :  { %1209 = vmatpush2.msra.mxu0 %v460_v20  ;;  %1278 = vmatpush2.msra.mxu1 %v592_v21  ;;  %v793_v18 = vld [vmem:[#allocation7 + $0xdd8] sm:$0xff]  ;;  %v660_v20 = vld [vmem:[#allocation7 + $0x9b0] sm:$0xff] }
 0x146   :  { %1210 = vmatprep.subr.mxu0 %v457_v22  ;;  %1279 = vmatprep.subr.mxu1 %v589_v23  ;;  %v657_v21 = vld [vmem:[#allocation7 + $0x998] sm:$0xff]  ;;  %v656_v23 = vld [vmem:[#allocation7 + $0x990] sm:$0xff] }
 0x147   :  { %1211 = vmatpush2.msra.mxu0 %v456_v26  ;;  %1280 = vmatpush2.msra.mxu1 %v588_v27  ;;  %v789_v22 = vld [vmem:[#allocation7 + $0xdb8] sm:$0xff]  ;;  %v788_v26 = vld [vmem:[#allocation7 + $0xdb0] sm:$0xff] }
 0x148   :  { %1212 = vmatprep.subr.mxu0 %v453_v28  ;;  %1281 = vmatprep.subr.mxu1 %v585_v29  ;;  %v652_v27 = vld [vmem:[#allocation7 + $0x970] sm:$0xff]  ;;  %v649_v29 = vld [vmem:[#allocation7 + $0x958] sm:$0xff] }
 0x149   :  { %1213 = vmatpush2.msra.mxu0 %v452_v30  ;;  %1282 = vmatpush2.msra.mxu1 %v584_v31  ;;  %v784_v28 = vld [vmem:[#allocation7 + $0xd90] sm:$0xff]  ;;  %v781_v30 = vld [vmem:[#allocation7 + $0xd78] sm:$0xff] }
 0x14a   :  { %1214 = vmatprep.subr.mxu0 %v449_v35  ;;  %1283 = vmatprep.subr.mxu1 %v581_v36  ;;  %v648_v31 = vld [vmem:[#allocation7 + $0x950] sm:$0xff]  ;;  %v645_v35 = vld [vmem:[#allocation7 + $0x938] sm:$0xff]  ;;  %v2444_v36 = vpop.permute.xlu1 %287 }
 0x14b   :  { %1215 = vmatpush2.msra.mxu0 %v448_v37  ;;  %1284 = vmatpush2.msra.mxu1 %v580_v39  ;;  %v777_v37 = vld [vmem:[#allocation7 + $0xd58] sm:$0xff]  ;;  %v644_v39 = vld [vmem:[#allocation7 + $0x930] sm:$0xff] }
 0x14c   :  { %1216 = vmatprep.subr.mxu0 %v445_v40  ;;  %1285 = vmatprep.subr.mxu1 %v577_v41  ;;  %v776_v40 = vld [vmem:[#allocation7 + $0xd50] sm:$0xff]  ;;  %v641_v41 = vld [vmem:[#allocation7 + $0x918] sm:$0xff] }
 0x14d   :  { %1217 = vmatpush2.msra.mxu0 %v444_v42  ;;  %1286 = vmatpush2.msra.mxu1 %v576_v43  ;;  %v773_v42 = vld [vmem:[#allocation7 + $0xd38] sm:$0xff]  ;;  %v640_v43 = vld [vmem:[#allocation7 + $0x910] sm:$0xff] }
 0x14e   :  { %1218 = vmatprep.subr.mxu0 %v441_v45  ;;  %1287 = vmatprep.subr.mxu1 %v573_v46  ;;  %v772_v45 = vld [vmem:[#allocation7 + $0xd30] sm:$0xff]  ;;  %v637_v46 = vld [vmem:[#allocation7 + $0x8f8] sm:$0xff] }
 0x14f   :  { %1219 = vmatpush2.msra.mxu0 %v440_v47  ;;  %1288 = vmatpush2.msra.mxu1 %v572_v48  ;;  %v769_v47 = vld [vmem:[#allocation7 + $0xd18] sm:$0xff]  ;;  %v636_v48 = vld [vmem:[#allocation7 + $0x8f0] sm:$0xff] }
 0x150   :  { %1220 = vmatprep.subr.mxu0 %v437_v49  ;;  %1289 = vmatprep.subr.mxu1 %v569_v50  ;;  %v768_v49 = vld [vmem:[#allocation7 + $0xd10] sm:$0xff]  ;;  %v633_v50 = vld [vmem:[#allocation7 + $0x8d8] sm:$0xff] }
 0x151   :  { %1221 = vmatpush2.msra.mxu0 %v436_v51  ;;  %1290 = vmatpush2.msra.mxu1 %v568_v52  ;;  %v2446_v51 = vpop.permute.xlu1 %289  ;;  %v765_v52 = vld [vmem:[#allocation7 + $0xcf8] sm:$0xff] }
 0x152   :  { %1222 = vmatprep.subr.mxu0 %v433_v15  ;;  %1291 = vmatprep.subr.mxu1 %v565_v53  ;;  %v632_v15 = vld [vmem:[#allocation7 + $0x8d0] sm:$0xff] }
 0x153   :  { %1223 = vmatpush2.msra.mxu0 %v432_v54  ;;  %1292 = vmatpush2.msra.mxu1 %v564_v55  ;;  %v764_v53 = vld [vmem:[#allocation7 + $0xcf0] sm:$0xff]  ;;  %v629_v54 = vld [vmem:[#allocation7 + $0x8b8] sm:$0xff] }
 0x154   :  { %1224 = vmatprep.subr.mxu0 %v429_v56  ;;  %1293 = vmatprep.subr.mxu1 %v561_v57  ;;  %v761_v55 = vld [vmem:[#allocation7 + $0xcd8] sm:$0xff]  ;;  %v628_v56 = vld [vmem:[#allocation7 + $0x8b0] sm:$0xff] }
 0x155   :  { %1225 = vmatpush2.msra.mxu0 %v428_v59  ;;  %1294 = vmatpush2.msra.mxu1 %v560_v60  ;;  %v760_v57 = vld [vmem:[#allocation7 + $0xcd0] sm:$0xff]  ;;  %v625_v59 = vld [vmem:[#allocation7 + $0x898] sm:$0xff] }
 0x156   :  { %1226 = vmatprep.subr.mxu0 %v425_v61  ;;  %1295 = vmatprep.subr.mxu1 %v557_v62  ;;  %v757_v60 = vld [vmem:[#allocation7 + $0xcb8] sm:$0xff]  ;;  %v624_v61 = vld [vmem:[#allocation7 + $0x890] sm:$0xff] }
 0x157   :  { %1227 = vmatpush2.msra.mxu0 %v424_v0  ;;  %1296 = vmatpush2.msra.mxu1 %v556_v1  ;;  %v756_v62 = vld [vmem:[#allocation7 + $0xcb0] sm:$0xff]  ;;  %v621_v0 = vld [vmem:[#allocation7 + $0x878] sm:$0xff]  ;;  %v2448_v1 = vpop.permute.xlu1 %245 }
 0x158   :  { %1228 = vmatprep.subr.mxu0 %v421_v2  ;;  %1297 = vmatprep.subr.mxu1 %v553_v3  ;;  %v753_v2 = vld [vmem:[#allocation7 + $0xc98] sm:$0xff]  ;;  %v620_v3 = vld [vmem:[#allocation7 + $0x870] sm:$0xff] }
 0x159   :  { %1229 = vmatpush2.msra.mxu0 %v420_v4  ;;  %1298 = vmatpush2.msra.mxu1 %v552_v5  ;;  %v752_v4 = vld [vmem:[#allocation7 + $0xc90] sm:$0xff]  ;;  %v617_v5 = vld [vmem:[#allocation7 + $0x858] sm:$0xff] }
 0x15a   :  { %1230 = vmatprep.subr.mxu0 %v417_v6  ;;  %1299 = vmatprep.subr.mxu1 %v549_v19  ;;  %v2450_v6 = vpop.permute.xlu0 %243  ;;  %v749_v19 = vld [vmem:[#allocation7 + $0xc78] sm:$0xff] }
 0x15b   :  { %1231 = vmatpush2.msra.mxu0 %v416_v7  ;;  %1300 = vmatpush2.msra.mxu1 %v548_v8  ;;  %v616_v7 = vld [vmem:[#allocation7 + $0x850] sm:$0xff] }
 0x15c   :  { %1233 = vmatmul.mubr.f32.vlgmr.msra.gmra.mxu0 %v2371_v25  ;;  %1301 = vmatprep.subr.mxu1 %v545_v24  ;;  %v792_v25 = vld [vmem:[#allocation7 + $0xdd0] sm:$0xff]  ;;  %v613_v24 = vld [vmem:[#allocation7 + $0x838] sm:$0xff] }
 0x15d   :  { %1310 = vmatprep.subr.mxu0 %v669_v9  ;;  %1302 = vmatpush2.msra.mxu1 %v544_v10  ;;  %v748_v8 = vld [vmem:[#allocation7 + $0xc70] sm:$0xff]  ;;  %v745_v9 = vld [vmem:[#allocation7 + $0xc58] sm:$0xff] }
 0x15e   :  { %1311 = vmatpush1.msra.mxu0 %v668_v11  ;;  %1374 = vmatprep.mubr.f32.mxu0 %v2379_v33  ;;  %v653_v33 = vld [vmem:[#allocation7 + $0x978] sm:$0xff]  ;;  %v612_v10 = vld [vmem:[#allocation7 + $0x830] sm:$0xff] }
 0x15f   :  { %1304 = vmatmul.mubr.f32.vlgmr.msra.gmra.mxu1 %v2382_v34  ;;  %1312 = vmatprep.subr.mxu0 %v665_v12  ;;  %v785_v34 = vld [vmem:[#allocation7 + $0xd98] sm:$0xff]  ;;  %v744_v11 = vld [vmem:[#allocation7 + $0xc50] sm:$0xff] }
 0x160   :  { %1381 = vmatprep.subr.mxu1 %v797_v13  ;;  %1313 = vmatpush1.msra.mxu0 %v664_v14  ;;  %v609_v12 = vld [vmem:[#allocation7 + $0x818] sm:$0xff]  ;;  %v2452_v13 = vpop.permute.xlu1 %267 }
 0x161   :  { %1382 = vmatpush1.msra.mxu1 %v796_v32  ;;  %1445 = vmatprep.mubr.f32.mxu1 %v2394_v44  ;;  %v780_v44 = vld [vmem:[#allocation7 + $0xd70] sm:$0xff]  ;;  %v741_v14 = vld [vmem:[#allocation7 + $0xc38] sm:$0xff] }
 0x162   :  { %1314 = vmatprep.subr.mxu0 %v661_v16  ;;  %1383 = vmatprep.subr.mxu1 %v793_v18  ;;  %v608_v32 = vld [vmem:[#allocation7 + $0x810] sm:$0xff]  ;;  %v733_v18 = vld [vmem:[#allocation7 + $0xbf8] sm:$0xff] }
 0x163   :  { %1315 = vmatpush1.msra.mxu0 %v660_v20  ;;  %1384 = vmatpush1.msra.mxu1 %v792_v25  ;;  %v740_v16 = vld [vmem:[#allocation7 + $0xc30] sm:$0xff]  ;;  %v2454_v20 = vpop.permute.xlu0 %265  ;;  %v737_v25 = vld [vmem:[#allocation7 + $0xc18] sm:$0xff] }
 0x164   :  { %1316 = vmatprep.subr.mxu0 %v657_v21  ;;  %1385 = vmatprep.subr.mxu1 %v789_v22  ;;  %v732_v21 = vld [vmem:[#allocation7 + $0xbf0] sm:$0xff] }
 0x165   :  { %1317 = vmatpush1.msra.mxu0 %v656_v23  ;;  %1386 = vmatpush1.msra.mxu1 %v788_v26  ;;  %v736_v22 = vld [vmem:[#allocation7 + $0xc10] sm:$0xff]  ;;  %v729_v23 = vld [vmem:[#allocation7 + $0xbd8] sm:$0xff] }
 0x166   :  { %1318 = vmatprep.subr.mxu0 %v653_v33  ;;  %1387 = vmatprep.subr.mxu1 %v785_v34  ;;  %v861_v26 = vld [vmem:[#allocation7 + $0xff8] sm:$0xff]  ;;  %v728_v33 = vld [vmem:[#allocation7 + $0xbd0] sm:$0xff] }
 0x167   :  { %1319 = vmatpush1.msra.mxu0 %v652_v27  ;;  %1388 = vmatpush1.msra.mxu1 %v784_v28  ;;  %v860_v34 = vld [vmem:[#allocation7 + $0xff0] sm:$0xff]  ;;  %v725_v27 = vld [vmem:[#allocation7 + $0xbb8] sm:$0xff]  ;;  %v2456_v28 = vpop.permute.xlu1 %179 }
 0x168   :  { %1320 = vmatprep.subr.mxu0 %v649_v29  ;;  %1389 = vmatprep.subr.mxu1 %v781_v30  ;;  %v857_v29 = vld [vmem:[#allocation7 + $0xfd8] sm:$0xff]  ;;  %v724_v30 = vld [vmem:[#allocation7 + $0xbb0] sm:$0xff] }
 0x169   :  { %1321 = vmatpush1.msra.mxu0 %v648_v31  ;;  %1390 = vmatpush1.msra.mxu1 %v780_v44  ;;  %v856_v31 = vld [vmem:[#allocation7 + $0xfd0] sm:$0xff]  ;;  %v721_v44 = vld [vmem:[#allocation7 + $0xb98] sm:$0xff] }
 0x16a   :  { %1322 = vmatprep.subr.mxu0 %v645_v35  ;;  %1391 = vmatprep.subr.mxu1 %v777_v37  ;;  %v2458_v35 = vpop.permute.xlu0 %177  ;;  %v853_v37 = vld [vmem:[#allocation7 + $0xfb8] sm:$0xff] }
 0x16b   :  { %1323 = vmatpush1.msra.mxu0 %v644_v39  ;;  %1392 = vmatpush1.msra.mxu1 %v776_v40  ;;  %v720_v39 = vld [vmem:[#allocation7 + $0xb90] sm:$0xff] }
 0x16c   :  { %1324 = vmatprep.subr.mxu0 %v641_v41  ;;  %1393 = vmatprep.subr.mxu1 %v773_v42  ;;  %v852_v40 = vld [vmem:[#allocation7 + $0xfb0] sm:$0xff]  ;;  %v717_v41 = vld [vmem:[#allocation7 + $0xb78] sm:$0xff]  ;;  %v136_v42 = vlaneseq }
 0x16d   :  { %1325 = vmatpush1.msra.mxu0 %v640_v43  ;;  %1394 = vmatpush1.msra.mxu1 %v772_v45  ;;  %v849_v43 = vld [vmem:[#allocation7 + $0xf98] sm:$0xff]  ;;  %v716_v45 = vld [vmem:[#allocation7 + $0xb70] sm:$0xff] }
 0x16e   :  { %1326 = vmatprep.subr.mxu0 %v637_v46  ;;  %1395 = vmatprep.subr.mxu1 %v769_v47  ;;  %v848_v46 = vld [vmem:[#allocation7 + $0xf90] sm:$0xff]  ;;  %v713_v47 = vld [vmem:[#allocation7 + $0xb58] sm:$0xff] }
 0x16f   :  { %1327 = vmatpush1.msra.mxu0 %v636_v48  ;;  %1396 = vmatpush1.msra.mxu1 %v768_v49  ;;  %v2460_v48 = vpop.permute.xlu1 %223  ;;  %v845_v49 = vld [vmem:[#allocation7 + $0xf78] sm:$0xff] }
 0x170   :  { %1328 = vmatprep.subr.mxu0 %v633_v50  ;;  %1397 = vmatprep.subr.mxu1 %v765_v52  ;;  %v712_v50 = vld [vmem:[#allocation7 + $0xb50] sm:$0xff] }
 0x171   :  { %1329 = vmatpush1.msra.mxu0 %v632_v15  ;;  %1398 = vmatpush1.msra.mxu1 %v764_v53  ;;  %v844_v52 = vld [vmem:[#allocation7 + $0xf70] sm:$0xff]  ;;  %v709_v15 = vld [vmem:[#allocation7 + $0xb38] sm:$0xff]  ;;  %v2462_v53 = vshrl.u32 %v136_v42, 7 }
 0x172   :  { %1330 = vmatprep.subr.mxu0 %v629_v54  ;;  %1399 = vmatprep.subr.mxu1 %v761_v55  ;;  %v2464_v54 = vpop.permute.xlu0 %221  ;;  %v841_v55 = vld [vmem:[#allocation7 + $0xf58] sm:$0xff] }
 0x173   :  { %1331 = vmatpush1.msra.mxu0 %v628_v56  ;;  %1400 = vmatpush1.msra.mxu1 %v760_v57  ;;  %v708_v56 = vld [vmem:[#allocation7 + $0xb30] sm:$0xff] }
 0x174   :  { %1332 = vmatprep.subr.mxu0 %v625_v59  ;;  %1401 = vmatprep.subr.mxu1 %v757_v60  ;;  %v840_v57 = vld [vmem:[#allocation7 + $0xf50] sm:$0xff]  ;;  %v705_v59 = vld [vmem:[#allocation7 + $0xb18] sm:$0xff] }
 0x175   :  { %1333 = vmatpush1.msra.mxu0 %v624_v61  ;;  %1402 = vmatpush1.msra.mxu1 %v756_v62  ;;  %v837_v60 = vld [vmem:[#allocation7 + $0xf38] sm:$0xff]  ;;  %v704_v61 = vld [vmem:[#allocation7 + $0xb10] sm:$0xff]  ;;  %v2466_v62 = vand.u32 127, %v136_v42 }
 0x176   :  { %1334 = vmatprep.subr.mxu0 %v621_v0  ;;  %1403 = vmatprep.subr.mxu1 %v753_v2  ;;  %v836_v0 = vld [vmem:[#allocation7 + $0xf30] sm:$0xff]  ;;  %v701_v2 = vld [vmem:[#allocation7 + $0xaf8] sm:$0xff] }
 0x177   :  { %1335 = vmatpush1.msra.mxu0 %v620_v3  ;;  %1404 = vmatpush1.msra.mxu1 %v752_v4  ;;  %v2469_v3 = vsub.s32 0, %v2462_v53  ;;  %v295_v4 = vld [vmem:[#allocation11 + $0x10] ss:$8 sm:$0x3]  ;;  %vm291_vm1 = vcmp.lt.s32.totalorder %v2466_v62, 111  ;;  %vm269_vm2 = vcmp.lt.s32.totalorder %v2466_v62, 112 }
 0x178   :  { %1336 = vmatprep.subr.mxu0 %v617_v5  ;;  %1405 = vmatprep.subr.mxu1 %v749_v19  ;;  %v2471_v5 = vpop.permute.xlu1 %134  ;;  %v833_v19 = vld [vmem:[#allocation7 + $0xf18] sm:$0xff]  ;;  %vm225_vm3 = vcmp.lt.s32.totalorder %v2466_v62, 127  ;;  %vm247_vm4 = vcmp.lt.s32.totalorder %v2466_v62, 113  ;;  %vm203_vm5 = vcmp.lt.s32.totalorder %v2466_v62, 1  ;;  %vm159_vm6 = vcmp.lt.s32.totalorder %v2466_v62, 16 }
 0x179   :  { %1337 = vmatpush1.msra.mxu0 %v616_v7  ;;  %1406 = vmatpush1.msra.mxu1 %v748_v8  ;;  %v700_v7 = vld [vmem:[#allocation7 + $0xaf0] sm:$0xff]  ;;  %v2474_v8 = vsub.s32 1, %v2462_v53  ;;  %vm181_vm7 = vcmp.lt.s32.totalorder %v2466_v62, 15  ;;  %vm138_vm9 = vcmp.lt.s32.totalorder %v2466_v62, 17  ;;  %v1835_v62 = vld [vmem:[#allocation10] sm:$0xf] }
 0x17a   :  { %1338 = vmatprep.subr.mxu0 %v613_v24  ;;  %1407 = vmatprep.subr.mxu1 %v745_v9  ;;  %v251_v24 = vld [vmem:[#allocation11 + $0x6] ss:$8 sm:$0x3] }
 0x17b   :  { %1339 = vmatpush1.msra.mxu0 %v612_v10  ;;  %1408 = vmatpush1.msra.mxu1 %v744_v11  ;;  %v832_v9 = vld [vmem:[#allocation7 + $0xf10] sm:$0xff]  ;;  %v697_v10 = vld [vmem:[#allocation7 + $0xad8] sm:$0xff] }
 0x17c   :  { %1340 = vmatprep.subr.mxu0 %v609_v12  ;;  %1409 = vmatprep.subr.mxu1 %v741_v14  ;;  %v273_v11 = vld [vmem:[#allocation11 + $0x7] ss:$8 sm:$0x3]  ;;  %v2476_v12 = vpop.permute.xlu0 %132  ;;  %v829_v14 = vld [vmem:[#allocation7 + $0xef8] sm:$0xff] }
 0x17d   :  { %1341 = vmatpush1.msra.mxu0 %v608_v32  ;;  %1410 = vmatpush1.msra.mxu1 %v740_v16  ;;  %v696_v32 = vld [vmem:[#allocation7 + $0xad0] sm:$0xff]  ;;  %v2500_v42 = vrot.slane %v273_v11, %v2474_v8 }
 0x17e   :  { %1342 = vmatprep.subr.mxu0 %v733_v18  ;;  %1411 = vmatprep.subr.mxu1 %v737_v25  ;;  %v185_v16 = vld [vmem:[#allocation11 + $0x2] ss:$8 sm:$0x3]  ;;  %v693_v25 = vld [vmem:[#allocation7 + $0xab8] sm:$0xff] }
 0x17f   :  { %1343 = vmatpush2.msra.mxu0 %v732_v21  ;;  %1412 = vmatpush1.msra.mxu1 %v736_v22  ;;  %v828_v18 = vld [vmem:[#allocation7 + $0xef0] sm:$0xff]  ;;  %v825_v22 = vld [vmem:[#allocation7 + $0xed8] sm:$0xff] }
 0x180   :  { %1344 = vmatprep.subr.mxu0 %v729_v23  ;;  %1413 = vmatprep.subr.mxu1 %v861_v26  ;;  %v229_v21 = vld [vmem:[#allocation11 + $0x5] ss:$8 sm:$0x3]  ;;  %v2480_v26 = vrot.slane %v295_v4, %v2469_v3 }
 0x181   :  { %1345 = vmatpush2.msra.mxu0 %v728_v33  ;;  %1414 = vmatpush2.msra.mxu1 %v860_v34  ;;  %v692_v23 = vld [vmem:[#allocation7 + $0xab0] sm:$0xff]  ;;  %v2483_v33 = vrot.slane %v295_v4, %v2474_v8  ;;  %v270_v4 = vsel %vm269_vm2, %v2454_v20, %v2452_v13 }
 0x182   :  { %1346 = vmatprep.subr.mxu0 %v725_v27  ;;  %1415 = vmatprep.subr.mxu1 %v857_v29  ;;  %v2485_v34 = vld [vmem:[#allocation11] ss:$8 sm:$0x3]  ;;  %v689_v29 = vld [vmem:[#allocation7 + $0xa98] sm:$0xff] }
 0x183   :  { %1347 = vmatpush2.msra.mxu0 %v724_v30  ;;  %1416 = vmatpush2.msra.mxu1 %v856_v31  ;;  %v824_v27 = vld [vmem:[#allocation7 + $0xed0] sm:$0xff]  ;;  %v2488_v30 = vrot.slane %v251_v24, %v2469_v3  ;;  %v2491_v31 = vrot.slane %v251_v24, %v2474_v8  ;;  %v813_v24 = vld [vmem:[#allocation7 + $0xe78] sm:$0xff] }
 0x184   :  { %1348 = vmatprep.subr.mxu0 %v721_v44  ;;  %1417 = vmatprep.subr.mxu1 %v853_v37  ;;  %v2495_v44 = vrot.slane %v273_v11, %v2469_v3  ;;  %v207_v37 = vld [vmem:[#allocation11 + $0x3] ss:$8 sm:$0x3] }
 0x185   :  { %1349 = vmatpush2.msra.mxu0 %v720_v39  ;;  %1418 = vmatpush2.msra.mxu1 %v852_v40  ;;  %v2497_v39 = vpop.permute.xlu1 %201  ;;  %v821_v40 = vld [vmem:[#allocation7 + $0xeb8] sm:$0xff]  ;;  %v812_v11 = vld [vmem:[#allocation7 + $0xe70] sm:$0xff] }
 0x186   :  { %1350 = vmatprep.subr.mxu0 %v717_v41  ;;  %1419 = vmatprep.subr.mxu1 %v849_v43  ;;  %v688_v41 = vld [vmem:[#allocation7 + $0xa90] sm:$0xff]  ;;  %v2503_v43 = vrot.slane %v185_v16, %v2469_v3 }
 0x187   :  { %1351 = vmatpush2.msra.mxu0 %v716_v45  ;;  %1420 = vmatpush2.msra.mxu1 %v848_v46  ;;  %v2506_v45 = vrot.slane %v185_v16, %v2474_v8  ;;  %v163_v46 = vld [vmem:[#allocation11 + $0x1] ss:$8 sm:$0x3] }
 0x188   :  { %1352 = vmatprep.subr.mxu0 %v713_v47  ;;  %1421 = vmatprep.subr.mxu1 %v845_v49  ;;  %v820_v47 = vld [vmem:[#allocation7 + $0xeb0] sm:$0xff]  ;;  %v685_v49 = vld [vmem:[#allocation7 + $0xa78] sm:$0xff] }
 0x189   :  { %1353 = vmatpush2.msra.mxu0 %v712_v50  ;;  %1422 = vmatpush2.msra.mxu1 %v844_v52  ;;  %v200_v50 = vpop.permute.xlu0 %199  ;;  %v2510_v52 = vrot.slane %v229_v21, %v2469_v3 }
 0x18a   :  { %1354 = vmatprep.subr.mxu0 %v709_v15  ;;  %1423 = vmatprep.subr.mxu1 %v841_v55  ;;  %v2513_v15 = vrot.slane %v229_v21, %v2474_v8  ;;  %v2517_v55 = vrot.slane %v2485_v34, %v2469_v3  ;;  %v676_v21 = vld [vmem:[#allocation7 + $0xa30] sm:$0xff] }
 0x18b   :  { %1355 = vmatpush2.msra.mxu0 %v708_v56  ;;  %1424 = vmatpush2.msra.mxu1 %v840_v57  ;;  %v817_v56 = vld [vmem:[#allocation7 + $0xe98] sm:$0xff]  ;;  %v684_v57 = vld [vmem:[#allocation7 + $0xa70] sm:$0xff] }
 0x18c   :  { %1356 = vmatprep.subr.mxu0 %v705_v59  ;;  %1425 = vmatprep.subr.mxu1 %v837_v60  ;;  %v292_v59 = vsel %vm291_vm1, %v2444_v36, %v2446_v51  ;;  %v271_v60 = vsel %vm269_vm2, %v2452_v13, %v2454_v20  ;;  %v227_v13 = vsel %vm225_vm3, %v2460_v48, %v2464_v54 }
 0x18d   :  { %1357 = vmatpush2.msra.mxu0 %v704_v61  ;;  %1426 = vmatpush2.msra.mxu1 %v836_v0  ;;  %v2529_v61 = vrot.slane %v207_v37, %v2469_v3  ;;  %v816_v0 = vld [vmem:[#allocation7 + $0xe90] sm:$0xff]  ;;  %v2551_v20 = vrot.slane %v163_v46, %v2474_v8  ;;  %v2555_v16 = vmul.f32 %v2480_v26, %v292_v59 }
 0x18e   :  { %1358 = vmatprep.subr.mxu0 %v701_v2  ;;  %1427 = vmatprep.subr.mxu1 %v833_v19  ;;  %v681_v2 = vld [vmem:[#allocation7 + $0xa58] sm:$0xff]  ;;  %v2537_v19 = vrot.slane %v207_v37, %v2474_v8  ;;  %v2578_v37 = vmul.f32 %v2513_v15, %v227_v13  ;;  %v182_v13 = vsel %vm181_vm7, %v2458_v35, %v2456_v28 }
 0x18f   :  { %1359 = vmatpush2.msra.mxu0 %v700_v7  ;;  %1428 = vmatpush2.msra.mxu1 %v832_v9  ;;  %v2540_v7 = vrot.slane %v163_v46, %v2469_v3  ;;  %v680_v9 = vld [vmem:[#allocation7 + $0xa50] sm:$0xff]  ;;  %v805_v46 = vld [vmem:[#allocation7 + $0xe38] sm:$0xff] }
 0x190   :  { %1360 = vmatprep.subr.mxu0 %v697_v10  ;;  %1429 = vmatprep.subr.mxu1 %v829_v14  ;;  %v293_v10 = vsel %vm291_vm1, %v2446_v51, %v2444_v36  ;;  %v677_v14 = vld [vmem:[#allocation7 + $0xa38] sm:$0xff]  ;;  %v226_v36 = vsel %vm225_vm3, %v2464_v54, %v2460_v48  ;;  %v158_v51 = vpop.permute.xlu1 %157  ;;  %v204_v48 = vsel %vm203_vm5, %v200_v50, %v2497_v39  ;;  %v808_v54 = vld [vmem:[#allocation7 + $0xe50] sm:$0xff] }
 0x191   :  { %1361 = vmatpush2.msra.mxu0 %v696_v32  ;;  %1430 = vmatpush2.msra.mxu1 %v828_v18  ;;  %v1605_v32 = vrot.slane %v2385_v38, 4  ;;  %v2558_v18 = vmul.f32 %v2500_v42, %v271_v60  ;;  %v2596_v60 = vmul.f32 %v2537_v19, %v204_v48  ;;  %v140_v48 = vsel %vm138_vm9, %v2471_v5, %v2476_v12 }
 0x192   :  { %1362 = vmatprep.subr.mxu0 %v693_v25  ;;  %1431 = vmatprep.subr.mxu1 %v825_v22  ;;  %v809_v25 = vld [vmem:[#allocation7 + $0xe58] sm:$0xff]  ;;  %v249_v22 = vsel %vm247_vm4, %v2448_v1, %v2450_v6 }
 0x193   :  { %1363 = vmatpush2.msra.mxu0 %v692_v23  ;;  %1432 = vmatpush2.msra.mxu1 %v824_v27  ;;  %v2570_v23 = vmul.f32 %v2495_v44, %v270_v4  ;;  %v673_v27 = vld [vmem:[#allocation7 + $0xa18] sm:$0xff]  ;;  %v1473_v59 = vrot.slane %v2558_v18, 4  ;;  %v2604_v4 = vrot.slane %v2485_v34, %v2474_v8 }
 0x194   :  { %1364 = vmatprep.subr.mxu0 %v689_v29  ;;  %1433 = vmatprep.subr.mxu1 %v821_v40  ;;  %v308_v29 = vmul.f32 %v2483_v33, %v293_v10  ;;  %v156_v40 = vpop.permute.xlu0 %155 }
 0x195   :  { %1365 = vmatpush2.msra.mxu0 %v688_v41  ;;  %1434 = vmatpush2.msra.mxu1 %v820_v47  ;;  %v205_v41 = vsel %vm203_vm5, %v2497_v39, %v200_v50  ;;  %v672_v47 = vld [vmem:[#allocation7 + $0xa10] sm:$0xff]  ;;  %v264_v50 = vmul.f32 %v2491_v31, %v249_v22  ;;  %v139_v22 = vsel %vm138_vm9, %v2476_v12, %v2471_v5 }
 0x196   :  { %1366 = vmatprep.subr.mxu0 %v685_v49  ;;  %1435 = vmatprep.subr.mxu1 %v817_v56  ;;  %v248_v49 = vsel %vm247_vm4, %v2450_v6, %v2448_v1  ;;  %v2588_v56 = vmul.f32 %v2510_v52, %v226_v36  ;;  %v804_v39 = vld [vmem:[#allocation7 + $0xe30] sm:$0xff]  ;;  %v161_v1 = vsel %vm159_vm6, %v158_v51, %v156_v40  ;;  %v801_v6 = vld [vmem:[#allocation7 + $0xe18] sm:$0xff]  ;;  %v1615_v34 = vrot.slane %v308_v29, 4 }
 0x197   :  { %1367 = vmatpush2.msra.mxu0 %v684_v57  ;;  %1436 = vmatpush2.msra.mxu1 %v816_v0  ;;  %v160_v57 = vsel %vm159_vm6, %v156_v40, %v158_v51  ;;  %v1614_v0 = vrot.slane %v2555_v16, 4  ;;  %v263_v10 = vmul.f32 %v2488_v30, %v248_v49  ;;  %v183_v36 = vsel %vm181_vm7, %v2456_v28, %v2458_v35 }
 0x198   :  { %1368 = vmatprep.subr.mxu0 %v681_v2  ;;  %1437 = vmatprep.subr.mxu1 %v813_v24  ;;  %v1472_v2 = vrot.slane %v2570_v23, 4  ;;  %v2607_v24 = vmul.f32 %v2529_v61, %v205_v41  ;;  %v1466_v51 = vrot.slane %v2588_v56, 4  ;;  %v1484_v28 = vsel %vm1476_vm8, %v264_v50, %v1473_v59 }
 0x199   :  { %1369 = vmatpush2.msra.mxu0 %v680_v9  ;;  %1438 = vmatpush2.msra.mxu1 %v812_v11  ;;  %v800_v9 = vld [vmem:[#allocation7 + $0xe10] sm:$0xff]  ;;  %v1467_v11 = vrot.slane %v2578_v37, 4  ;;  %v198_v35 = vmul.f32 %v2506_v45, %v182_v13  ;;  %v197_v40 = vmul.f32 %v2503_v43, %v183_v36  ;;  %v154_v5 = vmul.f32 %v2604_v4, %v139_v22 }
 0x19a   :  { %1370 = vmatprep.subr.mxu0 %v677_v14  ;;  %1439 = vmatprep.subr.mxu1 %v809_v25  ;;  %v2616_v14 = vmul.f32 %v2551_v20, %v160_v57  ;;  %v175_v25 = vmul.f32 %v2540_v7, %v161_v1  ;;  %v874_v36 = vsub.s32 2, %v2462_v53 }
 0x19b   :  { %1371 = vmatpush2.msra.mxu0 %v676_v21  ;;  %1440 = vmatpush2.msra.mxu1 %v808_v54  ;;  %v1611_v21 = vrot.slane %v264_v50, 4  ;;  %v1460_v54 = vrot.slane %v2607_v24, 4  ;;  %v1482_v41 = vsel %vm1476_vm8, %v2385_v38, %v1467_v11  ;;  %v1599_v50 = vrot.slane %v198_v35, 4  ;;  %v1021_v11 = vpop.f32.mrf.mxu1 }
 0x19c   :  { %1372 = vmatprep.subr.mxu0 %v673_v27  ;;  %1441 = vmatprep.subr.mxu1 %v805_v46  ;;  %v1483_v27 = vsel %vm1476_vm8, %v263_v10, %v1472_v2  ;;  %v1454_v12 = vrot.slane %v175_v25, 4  ;;  %v1481_v46 = vsel %vm1476_vm8, %v2355_v17, %v1466_v51  ;;  %v1598_v1 = vrot.slane %v197_v40, 4  ;;  %v1485_v2 = vld [vmem:[#allocation5] sm:$0x3]  ;;  %v862_v51 = vld [vmem:[#allocation8] sm:$0xf] }
 0x19d   :  { %1373 = vmatpush2.msra.mxu0 %v672_v47  ;;  %1442 = vmatpush2.msra.mxu1 %v804_v39  ;;  %v153_v47 = vmul.f32 %v2517_v55, %v140_v48  ;;  %v1604_v39 = vrot.slane %v2355_v17, 4  ;;  %v1479_v59 = vsel %vm1476_vm8, %v197_v40, %v1460_v54  ;;  %v1619_v17 = vsel %vm1476_vm8, %v1599_v50, %v2596_v60 }
 0x19e   :  { %1375 = vmatmul.mubr.f32.vlgmr.msra.gmra.mxu0 %v2430_v58  ;;  %1443 = vmatprep.subr.mxu1 %v801_v6  ;;  %v1461_v58 = vrot.slane %v2596_v60, 4  ;;  %v2070_v60 = vld [vmem:[%s2808_s1 + $0x10] sm:$0xff]  ;;  %v871_v54 = vrot.slane %v862_v51, %v2474_v8 }
 0x19f   :  { %2072 = vmatprep.subr.msk.mxu0 %vm1476_vm8, %v308_v29  ;;  %1444 = vmatpush2.msra.mxu1 %v800_v9  ;;  %v1610_v29 = vrot.slane %v263_v10, 4  ;;  %v1477_v38 = vsel %vm1476_vm8, %v153_v47, %v1454_v12  ;;  %v2276_v9 = vmov 0.0  }
 0x1a0   :  { %2073 = vmatpush1.msk.msra.mxu0 %vm1476_vm8, %v2555_v16  ;;  %1446 = vmatmul.mubr.f32.vlgmr.msra.gmra.mxu1 %v2435_v63  ;;  %v1455_v16 = vrot.slane %v2616_v14, 4  ;;  %v1623_v63 = vsel %vm1476_vm8, %v1611_v21, %v2558_v18  ;;  %v1480_v57 = vsel %vm1476_vm8, %v198_v35, %v1461_v58  ;;  %v1621_v18 = vsel %vm1476_vm8, %v1605_v32, %v2578_v37 }
 0x1a1   :  { %1526 = vmatprep.subr.mxu0 %v1484_v28  ;;  %2075 = vmatprep.subr.msk.mxu1 %vm1476_vm8, %v1615_v34  ;;  %v1622_v49 = vsel %vm1476_vm8, %v1610_v29, %v2570_v23  ;;  %v1620_v23 = vsel %vm1476_vm8, %v1604_v39, %v2588_v56  ;;  %v1592_v32 = vrot.slane %v153_v47, 4  ;;  %v1618_v37 = vsel %vm1476_vm8, %v1598_v1, %v2607_v24  ;;  %v950_v24 = vpop.f32.mrf.mxu0  ;;  %v1023_v34 = vpop.f32.mrf.mxu1 }
 0x1a2   :  { %1527 = vmatpush1.msra.mxu0 %v1483_v27  ;;  %2076 = vmatpush1.msk.msra.mxu1 %vm1476_vm8, %v1614_v0  ;;  %v1478_v6 = vsel %vm1476_vm8, %v154_v5, %v1455_v16  ;;  %v1593_v0 = vrot.slane %v154_v5, 4  ;;  %v878_v58 = vsub.s32 3, %v2462_v53  ;;  %v867_v35 = vrot.slane %v862_v51, %v2469_v3 }
 0x1a3   :  { %1528 = vmatprep.subr.mxu0 %v1482_v41  ;;  %1652 = vmatprep.subr.mxu1 %v1623_v63  ;;  %v1616_v10 = vsel %vm1476_vm8, %v1592_v32, %v175_v25  ;;  %v952_v13 = vpop.f32.mrf.mxu0  ;;  %v875_v25 = vrot.slane %v862_v51, %v874_v36 }
 0x1a4   :  { %1529 = vmatpush1.msra.mxu0 %v1481_v46  ;;  %1653 = vmatpush1.msra.mxu1 %v1622_v49  ;;  %v1617_v56 = vsel %vm1476_vm8, %v1593_v0, %v2616_v14  ;;  %v879_v27 = vrot.slane %v862_v51, %v878_v58  ;;  %v951_v41 = vadd.f32 %v950_v24, %v867_v35 }
 0x1a5   :  { %1530 = vmatprep.subr.mxu0 %v1480_v57  ;;  %1654 = vmatprep.subr.mxu1 %v1621_v18  ;;  %v953_v5 = vadd.f32 %v952_v13, %v871_v54 }
 0x1a6   :  { %1531 = vmatpush1.msra.mxu0 %v1479_v59  ;;  %1655 = vmatpush1.msra.mxu1 %v1620_v23  ;;  %v1022_v47 = vadd.f32 %v1021_v11, %v951_v41 }
 0x1a7   :  { %1532 = vmatprep.subr.mxu0 %v1478_v6  ;;  %1656 = vmatprep.subr.mxu1 %v1619_v17  ;;  %v1024_v53 = vadd.f32 %v1023_v34, %v953_v5 }
 0x1a8   :  { %1533 = vmatpush1.msra.mxu0 %v1477_v38  ;;  %1566 = vmatprep.mubr.f32.mxu0 %v2276_v9 }
 0x1a9   :  { %1657 = vmatpush1.msra.mxu1 %v1618_v37  ;;  %2074 = vmatmul.mubr.msk.f32.vlgmr.msra.gmra.mxu0 %vm1492_vm10, %v1485_v2 }
 0x1aa   :  { %1658 = vmatprep.subr.mxu1 %v1617_v56  ;;  %1692 = vmatprep.mubr.f32.mxu1 %v2276_v9 }
 0x1ab   :  { %1659 = vmatpush1.msra.mxu1 %v1616_v10  ;;  %1725 = vperm.xlu1 %2105, %v2070_v60   ;;  %v1490_v60 = vpop.permute.xlu0 %1489 }
 0x1ac   :  { %2077 = vmatmul.mubr.msk.f32.vlgmr.msra.gmra.mxu1 %vm1492_vm10, %v1485_v2  ;;  %1915 = vmatprep.mubr.f32.mxu0 %v2276_v9 }
 0x1ad   :  { %2026 = vmatprep.mubr.f32.mxu1 %v2276_v9 }
 0x1da   :  { %v1092_v14 = vpop.f32.mrf.mxu0 }
 0x1db   :  { %v1093_v39 = vadd.f32 %v1092_v14, %v1022_v47 }
 0x1dc   :  { %v1094_v21 = vpop.f32.mrf.mxu0 }
 0x1dd   :  { %v1163_v22 = vpop.f32.mrf.mxu1  ;;  %v1095_v59 = vadd.f32 %v1094_v21, %v1024_v53 }
 0x1de   :  { %v1164_v6 = vadd.f32 %v1163_v22, %v1093_v39 }
 0x1df   :  { %v1165_v48 = vpop.f32.mrf.mxu1 }
 0x1e0   :  { %v1166_v0 = vadd.f32 %v1165_v48, %v1095_v59  ;;  %v1701_v2 = vrot.slane %v1164_v6, 1 }
 0x1e2   :  { %v1702_v32 = vrot.slane %v1166_v0, 1 }
 0x21c   :  { %v1234_v28 = vpop.f32.mrf.mxu0 }
 0x21d   :  { %v1235_v29 = vadd.f32 %v1234_v28, %v875_v25 }
 0x21e   :  { %v1236_v40 = vpop.f32.mrf.mxu0 }
 0x21f   :  { %v1305_v16 = vpop.f32.mrf.mxu1  ;;  %v1237_v12 = vadd.f32 %v1236_v40, %v879_v27 }
 0x220   :  { %v1306_v63 = vadd.f32 %v1305_v16, %v1235_v29 }
 0x221   :  { %v1307_v46 = vpop.f32.mrf.mxu1 }
 0x222   :  { %v1308_v50 = vadd.f32 %v1307_v46, %v1237_v12 }
 0x226   :  { %v1726_v54 = vpop.permute.xlu1 %1725 }
 0x25e   :  { %v1376_v49 = vpop.f32.mrf.mxu0 }
 0x25f   :  { %v1377_v57 = vadd.f32 %v1376_v49, %v1306_v63  ;;  %v1733_v63 = vpop.permute.xlu0 %1732 }
 0x260   :  { %v1378_v18 = vpop.f32.mrf.mxu0  ;;  %v1447_v3 = vpop.f32.mrf.mxu1 }
 0x261   :  { %v1379_v1 = vadd.f32 %v1378_v18, %v1308_v50  ;;  %v1448_v8 = vadd.f32 %v1447_v3, %v1377_v57  ;;  %v1836_v50 = vld [vmem:[%s2814_s7] sm:$0xf]  ;;  %s2277_s7 = smov [#allocation13]  }
 0x262   :  { %v1449_v23 = vpop.f32.mrf.mxu1  ;;  %s2057_s10 = sshll.u32 %s2277_s7, 4  ;;  %s2058_s10 = int_to_ptr.vmem [resolvable:$true] %s2057_s10 }
 0x263   :  { %v1450_v17 = vadd.f32 %v1449_v23, %v1379_v1  ;;  %v1575_v38 = vrot.slane %v1448_v8, 7  ;;  %v1705_v37 = vsel %vm341_vm0, %v1701_v2, %v1448_v8  ;;  %s2228_s11 = scalar_lea.vmem %s2058_s10, 256  ;;  %p2233_p3 = scmp.lt.s32.totalorder %s2058_s10, %s2058_s10 }
 0x264   :  { %v1709_v14 = vrot.slane %v1705_v37, 6  ;;  %p2229_p2 = scmp.ne.s32.totalorder %s2058_s10, %s2228_s11  ;;  %p2234_p4 = scmp.lt.s32.totalorder %s2228_s11, %s2228_s11 }
 0x265   :  { %v1576_v9 = vrot.slane %v1450_v17, 7  ;;  %v1579_v10 = vsel %vm341_vm0, %v1164_v6, %v1575_v38  ;;  %v1706_v24 = vsel %vm341_vm0, %v1702_v32, %v1450_v17 }
 0x266   :  { %v1583_v51 = vrot.slane %v1579_v10, 6  ;;  %v1710_v58 = vrot.slane %v1706_v24, 6  ;;  %p2235_p5 = por %p2234_p4, %p2233_p3 }
 0x267   :  { %v1580_v21 = vsel %vm341_vm0, %v1166_v0, %v1576_v9 }
 0x268   :  { %v1584_v27 = vrot.slane %v1580_v21, 6  ;;  %p2236_p6 = pnand %p2235_p5, %p2229_p2 }
 0x269   :  { %v1568_v56 = vpop.f32.mrf.mxu0 }
 0x26a   :  { %v1569_v34 = vadd.f32 %v1568_v56, %v1490_v60 }
 0x26b   :  { %v1570_v13 = vpop.f32.mrf.mxu0 }
 0x26c   :  { %v1694_v11 = vpop.f32.mrf.mxu1  ;;  %v1571_v25 = vadd.f32 %v1570_v13, %v1490_v60  ;;  %v1588_v40 = vsel %vm1587_vm11, %v1569_v34, %v1583_v51 }
 0x26d   :  { %v1695_v36 = vadd.f32 %v1694_v11, %v1490_v60 }
 0x26e   :  { %v1696_v22 = vpop.f32.mrf.mxu1  ;;  %v1589_v5 = vsel %vm1587_vm11, %v1571_v25, %v1584_v27 }
 0x26f   :  { %v1713_v28 = vsel %vm1587_vm11, %v1695_v36, %v1709_v14  ;;  %v1697_v35 = vadd.f32 %v1696_v22, %v1490_v60 }
 0x270   :  { %v1717_v48 = vrot.slane %v1713_v28, 4 }
 0x271   :  { %v1714_v29 = vsel %vm1587_vm11, %v1697_v35, %v1710_v58 }
 0x272   :  { %v1718_v16 = vrot.slane %v1714_v29, 4  ;;  %v1721_v41 = vsel %vm1476_vm8, %v1588_v40, %v1717_v48 }
 0x273   :  { %v1728_v12 = vmul.f32 %v1726_v54, %v1721_v41 }
 0x274   :  { %v1722_v46 = vsel %vm1476_vm8, %v1589_v5, %v1718_v16 }
 0x275   :  { %v1729_v47 = vmul.f32 %v1726_v54, %v1722_v46  ;;  %v1735_v49 = vadd.f32 %v1733_v63, %v1728_v12 }
 0x277   :  { %v1736_v57 = vadd.f32 %v1733_v63, %v1729_v47  ;;  %v2689_v53 = vmax.f32 %v1735_v49, 0.0 }
 0x279   :  { %v2691_v39 = vmax.f32 %v1736_v57, 0.0  ;;  %1795 = vrot.lane.b32.xlu1 %v2689_v53, %s2270_s21  ;;  %v1938_v35 = vrot.slane %v2689_v53, 4 }
 0x27b   :  { %1797 = vrot.lane.b32.xlu0 %v2691_v39, %s2270_s21  ;;  %v1939_v28 = vrot.slane %v2691_v39, 4 }
 0x27d   :  { %1779 = vrot.lane.b32.xlu1 %v2689_v53, %s2269_s8 }
 0x27f   :  { %1781 = vrot.lane.b32.xlu0 %v2691_v39, %s2269_s8 }
 0x281   :  { %1787 = vrot.lane.b32.xlu1 %v2689_v53, %s2271_s22 }
 0x283   :  { %1789 = vrot.lane.b32.xlu0 %v2691_v39, %s2271_s22 }
 0x285   :  { %1755 = vrot.lane.b32.xlu1 %v2689_v53, %s2272_s23 }
 0x287   :  { %1757 = vrot.lane.b32.xlu0 %v2691_v39, %s2272_s23 }
 0x289   :  { %1771 = vrot.lane.b32.xlu1 %v2689_v53, %s2273_s2 }
 0x28b   :  { %1773 = vrot.lane.b32.xlu0 %v2691_v39, %s2273_s2 }
 0x28d   :  { %1739 = vrot.lane.b32.xlu1 %v2689_v53, %s2274_s24 }
 0x28f   :  { %1741 = vrot.lane.b32.xlu0 %v2691_v39, %s2274_s24 }
 0x291   :  { %1763 = vrot.lane.b32.xlu1 %v2689_v53, %s2275_s25 }
 0x293   :  { %1765 = vrot.lane.b32.xlu0 %v2691_v39, %s2275_s25 }
 0x295   :  { %1747 = vrot.lane.b32.xlu1 %v2689_v53, %s2267_s15 }
 0x297   :  { %1749 = vrot.lane.b32.xlu0 %v2691_v39, %s2267_s15 }
 0x299   :  { %1839 = vperm.xlu1 %2105, %v1836_v50  }
 0x2eb   :  { %v1796_v18 = vpop.permute.xlu1 %1795 }
 0x2ed   :  { %v1798_v3 = vpop.permute.xlu0 %1797 }
 0x2ee   :  { %v1799_v59 = vsel %vm291_vm1, %v1796_v18, %v1798_v3  ;;  %v1800_v1 = vsel %vm291_vm1, %v1798_v3, %v1796_v18 }
 0x2ef   :  { %v1801_v8 = vmul.f32 %v1799_v59, %v2480_v26  ;;  %v1802_v23 = vmul.f32 %v1800_v1, %v2483_v33  ;;  %v1780_v6 = vpop.permute.xlu1 %1779 }
 0x2f1   :  { %v1948_v0 = vrot.slane %v1801_v8, 4  ;;  %v1949_v17 = vrot.slane %v1802_v23, 4  ;;  %v1782_v38 = vpop.permute.xlu0 %1781  ;;  %2078 = vmatprep.subr.msk.mxu0 %vm1476_vm8, %v1802_v23 }
 0x2f2   :  { %v1783_v2 = vsel %vm247_vm4, %v1780_v6, %v1782_v38  ;;  %v1784_v32 = vsel %vm247_vm4, %v1782_v38, %v1780_v6  ;;  %2079 = vmatpush1.msk.msra.mxu0 %vm1476_vm8, %v1801_v8 }
 0x2f3   :  { %v1785_v37 = vmul.f32 %v1783_v2, %v2488_v30  ;;  %v1786_v26 = vmul.f32 %v1784_v32, %v2491_v31  ;;  %2081 = vmatprep.subr.msk.mxu1 %vm1476_vm8, %v1949_v17  ;;  %v1788_v33 = vpop.permute.xlu1 %1787 }
 0x2f4   :  { %2082 = vmatpush1.msk.msra.mxu1 %vm1476_vm8, %v1948_v0 }
 0x2f5   :  { %v1790_v9 = vpop.permute.xlu0 %1789  ;;  %v1944_v10 = vrot.slane %v1785_v37, 4  ;;  %v1945_v24 = vrot.slane %v1786_v26, 4 }
 0x2f6   :  { %v1791_v56 = vsel %vm269_vm2, %v1788_v33, %v1790_v9  ;;  %v1792_v60 = vsel %vm269_vm2, %v1790_v9, %v1788_v33 }
 0x2f7   :  { %v1793_v13 = vmul.f32 %v1791_v56, %v2495_v44  ;;  %v1794_v30 = vmul.f32 %v1792_v60, %v2500_v42  ;;  %v1756_v11 = vpop.permute.xlu1 %1755 }
 0x2f9   :  { %v1823_v31 = vrot.slane %v1793_v13, 4  ;;  %v1824_v14 = vrot.slane %v1794_v30, 4  ;;  %v1758_v34 = vpop.permute.xlu0 %1757  ;;  %v1957_v36 = vsel %vm1476_vm8, %v1945_v24, %v1794_v30  ;;  %v1956_v51 = vsel %vm1476_vm8, %v1944_v10, %v1793_v13  ;;  %v2106_v24 = vld [vmem:[#allocation2] sm:$0xff] }
 0x2fa   :  { %1986 = vmatprep.subr.mxu1 %v1957_v36  ;;  %v1759_v48 = vsel %vm181_vm7, %v1756_v11, %v1758_v34  ;;  %v1760_v54 = vsel %vm181_vm7, %v1758_v34, %v1756_v11  ;;  %v2035_v13 = vrot.slane %v2106_v24, 4 }
 0x2fb   :  { %1987 = vmatpush1.msra.mxu1 %v1956_v51  ;;  %v1772_v21 = vpop.permute.xlu1 %1771  ;;  %v1834_v22 = vsel %vm1476_vm8, %v1786_v26, %v1824_v14  ;;  %v1833_v58 = vsel %vm1476_vm8, %v1785_v37, %v1823_v31  ;;  %v1761_v46 = vmul.f32 %v1760_v54, %v2503_v43  ;;  %v1762_v47 = vmul.f32 %v1759_v48, %v2506_v45  ;;  %v2107_v14 = vld [vmem:[#allocation2 + $0x8] sm:$0xff] }
 0x2fc   :  { %1875 = vmatprep.subr.mxu0 %v1834_v22  ;;  %v2036_v34 = vrot.slane %v2107_v14, 4 }
 0x2fd   :  { %v1774_v25 = vpop.permute.xlu0 %1773  ;;  %1876 = vmatpush1.msra.mxu0 %v1833_v58  ;;  %v1932_v1 = vrot.slane %v1761_v46, 4  ;;  %v1933_v8 = vrot.slane %v1762_v47, 4 }
 0x2fe   :  { %v1775_v44 = vsel %vm225_vm3, %v1772_v21, %v1774_v25  ;;  %v1776_v42 = vsel %vm225_vm3, %v1774_v25, %v1772_v21 }
 0x2ff   :  { %v1777_v27 = vmul.f32 %v1775_v44, %v2510_v52  ;;  %v1778_v29 = vmul.f32 %v1776_v42, %v2513_v15  ;;  %v1740_v40 = vpop.permute.xlu1 %1739 }
 0x301   :  { %v1817_v16 = vrot.slane %v1777_v27, 4  ;;  %v1818_v41 = vrot.slane %v1778_v29, 4  ;;  %v1742_v5 = vpop.permute.xlu0 %1741  ;;  %v1955_v12 = vsel %vm1476_vm8, %v1939_v28, %v1778_v29  ;;  %v1954_v63 = vsel %vm1476_vm8, %v1938_v35, %v1777_v27 }
 0x302   :  { %1988 = vmatprep.subr.mxu1 %v1955_v12  ;;  %v1743_v49 = vsel %vm138_vm9, %v1740_v40, %v1742_v5  ;;  %v1744_v52 = vsel %vm138_vm9, %v1742_v5, %v1740_v40 }
 0x303   :  { %v1764_v15 = vpop.permute.xlu1 %1763  ;;  %1989 = vmatpush1.msra.mxu1 %v1954_v63  ;;  %v1832_v57 = vsel %vm1476_vm8, %v2691_v39, %v1818_v41  ;;  %v1831_v50 = vsel %vm1476_vm8, %v2689_v53, %v1817_v16  ;;  %v1745_v43 = vmul.f32 %v1744_v52, %v2517_v55  ;;  %v1746_v45 = vmul.f32 %v1743_v49, %v2604_v4 }
 0x304   :  { %1877 = vmatprep.subr.mxu0 %v1832_v57 }
 0x305   :  { %v1766_v18 = vpop.permute.xlu0 %1765  ;;  %1878 = vmatpush1.msra.mxu0 %v1831_v50  ;;  %v1926_v38 = vrot.slane %v1745_v43, 4  ;;  %v1927_v2 = vrot.slane %v1746_v45, 4 }
 0x306   :  { %v1767_v3 = vsel %vm203_vm5, %v1764_v15, %v1766_v18  ;;  %v1768_v59 = vsel %vm203_vm5, %v1766_v18, %v1764_v15 }
 0x307   :  { %v1769_v39 = vmul.f32 %v1768_v59, %v2529_v61  ;;  %v1770_v23 = vmul.f32 %v1767_v3, %v2537_v19  ;;  %v1748_v0 = vpop.permute.xlu1 %1747 }
 0x309   :  { %v1811_v53 = vrot.slane %v1769_v39, 4  ;;  %v1812_v6 = vrot.slane %v1770_v23, 4  ;;  %v1750_v17 = vpop.permute.xlu0 %1749  ;;  %v1953_v55 = vsel %vm1476_vm8, %v1933_v8, %v1770_v23  ;;  %v1952_v4 = vsel %vm1476_vm8, %v1932_v1, %v1769_v39 }
 0x30a   :  { %v1751_v32 = vsel %vm159_vm6, %v1748_v0, %v1750_v17  ;;  %v1752_v37 = vsel %vm159_vm6, %v1750_v17, %v1748_v0  ;;  %1990 = vmatprep.subr.mxu1 %v1953_v55 }
 0x30b   :  { %v1753_v61 = vmul.f32 %v1752_v37, %v2540_v7  ;;  %v1754_v19 = vmul.f32 %v1751_v32, %v2551_v20  ;;  %1991 = vmatpush1.msra.mxu1 %v1952_v4  ;;  %v1830_v26 = vsel %vm1476_vm8, %v1762_v47, %v1812_v6  ;;  %v1829_v33 = vsel %vm1476_vm8, %v1761_v46, %v1811_v53 }
 0x30c   :  { %1879 = vmatprep.subr.mxu0 %v1830_v26 }
 0x30d   :  { %v1805_v9 = vrot.slane %v1753_v61, 4  ;;  %v1806_v56 = vrot.slane %v1754_v19, 4  ;;  %1880 = vmatpush1.msra.mxu0 %v1829_v33  ;;  %v1951_v60 = vsel %vm1476_vm8, %v1927_v2, %v1754_v19  ;;  %v1950_v10 = vsel %vm1476_vm8, %v1926_v38, %v1753_v61 }
 0x30e   :  { %1992 = vmatprep.subr.mxu1 %v1951_v60 }
 0x30f   :  { %1993 = vmatpush1.msra.mxu1 %v1950_v10  ;;  %v1828_v7 = vsel %vm1476_vm8, %v1746_v45, %v1806_v56  ;;  %v1827_v20 = vsel %vm1476_vm8, %v1745_v43, %v1805_v9 }
 0x310   :  { %1881 = vmatprep.subr.mxu0 %v1828_v7  ;;  %2083 = vmatmul.mubr.msk.f32.vlgmr.msra.gmra.mxu1 %vm1492_vm10, %v1835_v62 }
 0x311   :  { %1882 = vmatpush1.msra.mxu0 %v1827_v20 }
 0x312   :  { %2080 = vmatmul.mubr.msk.f32.vlgmr.msra.gmra.mxu0 %vm1492_vm10, %v1835_v62 }
 0x314   :  { %v1840_v30 = vpop.permute.xlu1 %1839 }
 0x3d0   :  { %v2028_v11 = vpop.f32.mrf.mxu1 }
 0x3d1   :  { %v2029_v31 = vadd.f32 %v2028_v11, %v1840_v30 }
 0x3d2   :  { %v1917_v36 = vpop.f32.mrf.mxu0  ;;  %v2030_v51 = vpop.f32.mrf.mxu1 }
 0x3d3   :  { %v2039_v21 = vadd.f32 %v2035_v13, %v2029_v31  ;;  %v1918_v22 = vadd.f32 %v1917_v36, %v1840_v30  ;;  %v2031_v58 = vadd.f32 %v2030_v51, %v1840_v30 }
 0x3d4   :  { %v1919_v25 = vpop.f32.mrf.mxu0 }
 0x3d5   :  { %v2043_v44 = vrot.slane %v2039_v21, 4  ;;  %v1922_v42 = vadd.f32 %v2106_v24, %v1918_v22  ;;  %v2040_v28 = vadd.f32 %v2036_v34, %v2031_v58  ;;  %v1920_v35 = vadd.f32 %v1919_v25, %v1840_v30 }
 0x3d7   :  { %v2044_v48 = vrot.slane %v2040_v28, 4  ;;  %v1923_v54 = vadd.f32 %v2107_v14, %v1920_v35  ;;  %v2047_v27 = vsel %vm1476_vm8, %v1922_v42, %v2043_v44 }
 0x3d8   :  { %2049 = vst [vmem:[#allocation13] sm:$0xff] %v2047_v27 }
 0x3d9   :  { %v2048_v29 = vsel %vm1476_vm8, %v1923_v54, %v2044_v48 }
 0x3da   :  { %2050 = vst [vmem:[#allocation13 + $0x8] sm:$0xff] %v2048_v29 }
 0x3db   :  { %2239 = shalt.err (!%p2236_p6)
}
 0x3dc   :  { %2060 = dma.vmem_to_hbm [thread:$0]  %s2058_s10, 256, %s2816_s9, [#allocation4]  }
 0x3dd   :  { %2256 = dma.done.wait [#allocation4], 256  }
 0x3de   :  { %2257 = vsyncadd [#allocation4], 4294967040 }
 0x3df   :  { %2064 = vsyncpa [#allocation3], 1 }
 0x3e0   :  { %2065 = vsyncpa [#allocation6], 1 }
 0x3e1   :  { %2066 = vsyncpa [#allocation9], 1 }
 0x3e2   :  { %2067 = vsyncpa [#allocation12], 1 }
 0x3e3   :  { %2068 = vsyncpa [#allocation4], 1 }

</bundles_post_ra>
